<compile_context>
chip_gen: v6e
topology: v6e:2x2x1
jax: 0.10.0
libtpu: 0.0.40
codegen_flags: <defaults>
</compile_context>

<pallas_src>
import jax
import jax.numpy as jnp
from jax.experimental import pallas as pl
from jax.experimental.pallas import tpu as pltpu

# ----- static configuration (small, consistent with the module) -----
B           = 256    # batch
H_BERT      = 64     # stand-in bert hidden size (real bert-base = 768)
FEAT_DIM    = 7      # feature_dim  (features[:, :-1] has FEAT_DIM columns)
FEAT_PAD    = FEAT_DIM + 1   # width of the features operand (incl. language-id column)
HIDDEN      = 32     # hidden_dim (small stand-in for 256)
NUM_CLASSES = 2
NUM_LANGS   = 7      # nn.Embedding(7, hidden_dim)
LANG_PAD    = HIDDEN # one-hot padded to HIDDEN lanes to match the folded emb rows

# row offsets inside the packed weight slab (all sublane-aligned, multiples of 8)
R_W1   = 0
R_POOL = R_W1 + FEAT_PAD         # 8
R_PF   = R_POOL + H_BERT         # 72
R_LE   = R_PF + HIDDEN           # 104
R_WC2  = R_LE + HIDDEN           # 136
R_END  = R_WC2 + HIDDEN          # 168


def head_kernel(pooled_ref, feat_ref, w_ref, b_ref, out_ref):
    """Fused head: 5 small MXU dots per batch tile, lane-exact (B, NUM_CLASSES) store."""
    f32 = jnp.float32
    tb = feat_ref.shape[0]

    feats = feat_ref[...]                                             # [TB, FEAT_PAD]

    # feature_processor Linear1 + ReLU (w1 is zero-padded over the lang column,
    # so dotting the full 8-wide features tile equals features[:, :-1] @ w1).
    h1 = jnp.dot(feats, w_ref[R_W1:R_POOL, :], preferred_element_type=f32) + b_ref[0:1, :]
    h1 = jnp.maximum(h1, 0.0)                                         # [TB, HIDDEN]

    # language one-hot; zero-padded embedding table is folded into w_ref[R_LE:R_WC2].
    # TODO(synk): ids outside [0, NUM_LANGS) yield a zero embedding row (a torch gather would error/clamp).
    lang = feats[:, FEAT_DIM:].astype(jnp.int32)                      # [TB, 1]
    lane_ids = jax.lax.broadcasted_iota(jnp.int32, (tb, LANG_PAD), 1)
    onehot = (lane_ids == lang).astype(f32)                           # [TB, LANG_PAD]

    # classifier Linear1 (+ folded feature-MLP Linear2 and embedding):
    # three accumulating MXU dots against row-slices of the packed slab (no lane concat).
    h = (jnp.dot(pooled_ref[...], w_ref[R_POOL:R_PF, :], preferred_element_type=f32)
         + jnp.dot(h1,            w_ref[R_PF:R_LE,  :], preferred_element_type=f32)
         + jnp.dot(onehot,        w_ref[R_LE:R_WC2, :], preferred_element_type=f32)
         + b_ref[1:2, :])
    h = jnp.maximum(h, 0.0)                                           # [TB, HIDDEN]

    # final classifier Linear: dot against lane-padded wc2, store only the real class lanes.
    logits = jnp.dot(h, w_ref[R_WC2:R_END, :], preferred_element_type=f32)
    out_ref[...] = logits[:, :NUM_CLASSES] + b_ref[2:3, :NUM_CLASSES]


def prepare_fused_params(p):
    """One-time algebraic fold + packing of all weights into two small slabs."""
    wc1 = p["wc1"]                                       # [H_BERT + 2*HIDDEN, HIDDEN]
    wc1_pooled = wc1[:H_BERT, :]                         # [64, 32]
    wc1_pf     = wc1[H_BERT:H_BERT + HIDDEN, :]          # [32, 32]
    wc1_le     = wc1[H_BERT + HIDDEN:, :]                # [32, 32]

    # feature_processor Linear1, zero row for the language-id column
    w1_pad = jnp.zeros((FEAT_PAD, HIDDEN), jnp.float32).at[:FEAT_DIM, :].set(p["w1"])

    # fold feature_processor Linear2 and the zero-padded embedding table into wc1 slices
    emb_pad = jnp.zeros((LANG_PAD, HIDDEN), jnp.float32).at[:NUM_LANGS, :].set(p["emb"])
    w_pf = p["w2"] @ wc1_pf                              # [32, 32]
    w_le = emb_pad @ wc1_le                              # [32, 32]

    # final classifier, lane-padded to HIDDEN so every slab shares one lane width
    wc2_pad = jnp.zeros((HIDDEN, HIDDEN), jnp.float32).at[:, :NUM_CLASSES].set(p["wc2"])

    w_all = jnp.concatenate([w1_pad, wc1_pooled, w_pf, w_le, wc2_pad], axis=0)  # [168, 32]

    b_comb  = p["bc1"] + p["b2"] @ wc1_pf                                        # [1, 32]
    bc2_pad = jnp.zeros((1, HIDDEN), jnp.float32).at[:, :NUM_CLASSES].set(p["bc2"])
    biases  = jnp.concatenate([p["b1"], b_comb, bc2_pad], axis=0)                # [3, 32]
    return w_all, biases


def _pick_tile_b(batch):
    """One full-batch tile on single-TC v5e/v6e; split across the 2 TensorCores on v7x."""
    try:
        kind = jax.devices()[0].device_kind.lower()
    except Exception:
        kind = ""
    if "v7" in kind and batch % 2 == 0 and (batch // 2) % 8 == 0:
        return batch // 2
    return batch


def make_enhanced_classifier_head(params, batch):
    """Returns a jitted (pooled, features) -> logits callable with fused weights cached."""
    w_all, biases = prepare_fused_params(params)     # one-time fold, not in the per-call path
    tile_b = _pick_tile_b(batch)
    grid = (batch // tile_b,)

    tile = lambda cols: pl.BlockSpec((tile_b, cols), lambda i: (i, 0))   # per-batch-tile block
    full = lambda shape: pl.BlockSpec(shape, lambda i: (0, 0))           # weights: same block

    call = pl.pallas_call(
        head_kernel,
        out_shape=jax.ShapeDtypeStruct((batch, NUM_CLASSES), jnp.float32),
        grid=grid,
        in_specs=[
            tile(H_BERT),                 # pooled [CLS] output
            tile(FEAT_PAD),               # features (real feats + language-id column)
            full((R_END, HIDDEN)),        # packed weight slab
            full((3, HIDDEN)),            # packed biases
        ],
        out_specs=tile(NUM_CLASSES),
        compiler_params=pltpu.CompilerParams(
            dimension_semantics=("parallel",)),   # shards 2 tiles across TCs on v7x; no-op at grid=(1,)
    )

    @jax.jit
    def head(pooled, features):
        return call(pooled, features, w_all, biases)

    return head


def init_params(key):
    """Deterministic PyTorch-style (uniform +-1/sqrt(fan_in)) initialization."""
    def linear(k, fan_in, fan_out):
        kw, kb = jax.random.split(k)
        lim = 1.0 / jnp.sqrt(fan_in)
        w = jax.random.uniform(kw, (fan_in, fan_out), jnp.float32, -lim, lim)
        b = jax.random.uniform(kb, (1, fan_out), jnp.float32, -lim, lim)
        return w, b

    ks = jax.random.split(key, 5)
    w1, b1 = linear(ks[0], FEAT_DIM, HIDDEN)
    w2, b2 = linear(ks[1], HIDDEN, HIDDEN)
    emb = jax.random.normal(ks[2], (NUM_LANGS, HIDDEN), jnp.float32)
    wc1, bc1 = linear(ks[3], H_BERT + 2 * HIDDEN, HIDDEN)
    wc2, bc2 = linear(ks[4], HIDDEN, NUM_CLASSES)
    return dict(w1=w1, b1=b1, w2=w2, b2=b2, emb=emb,
                wc1=wc1, bc1=bc1, wc2=wc2, bc2=bc2)


def reference_head(pooled, features, p):
    """Pure-JAX reference mirroring the PyTorch forward (eval mode).

    Note: the kernel's algebraic fold changes accumulation order; expect ~1e-5
    level float differences vs this reference (checked with atol=1e-4).
    """
    x = features[:, :FEAT_DIM]
    lang = features[:, FEAT_DIM].astype(jnp.int32)
    h1 = jax.nn.relu(x @ p["w1"] + p["b1"])
    pf = h1 @ p["w2"] + p["b2"]
    le = p["emb"][lang]
    combined = jnp.concatenate([pooled, pf, le], axis=1)
    h = jax.nn.relu(combined @ p["wc1"] + p["bc1"])
    return h @ p["wc2"] + p["bc2"]


if __name__ == "__main__":
    key = jax.random.PRNGKey(0)
    k_param, k_pool, k_feat, k_lang = jax.random.split(key, 4)

    params = init_params(k_param)

    # Synthetic pooled [CLS] output (stands in for the BERT backbone output).
    pooled = jax.random.normal(k_pool, (B, H_BERT), jnp.float32)

    # features: [B, FEAT_DIM + 1]; last column is integer-valued language id (module convention).
    real_feats = jax.random.normal(k_feat, (B, FEAT_DIM), jnp.float32)
    lang_ids = jax.random.randint(k_lang, (B, 1), 0, NUM_LANGS).astype(jnp.float32)
    features = jnp.concatenate([real_feats, lang_ids], axis=1)

    head = make_enhanced_classifier_head(params, batch=B)
    logits = jax.block_until_ready(head(pooled, features))

    ref = reference_head(pooled, features, params)
    assert logits.shape == (B, NUM_CLASSES)
    assert jnp.allclose(logits, ref, atol=1e-4, rtol=1e-4), "mismatch vs JAX reference"

    print("KERNEL_OK")
</pallas_src>

<mosaic_0001>
module attributes {stable_mosaic.version = 11 : i64} {
  func.func @head_kernel(%arg0: i32, %arg1: memref<256x64xf32, #tpu.memory_space<vmem>>, %arg2: memref<256x8xf32, #tpu.memory_space<vmem>>, %arg3: memref<168x32xf32, #tpu.memory_space<vmem>>, %arg4: memref<3x32xf32, #tpu.memory_space<vmem>>, %arg5: memref<256x2xf32, #tpu.memory_space<vmem>>) attributes {dimension_semantics = [#tpu.dimension_semantics<parallel>], iteration_bounds = array<i64: 1>, scalar_prefetch = 0 : i64, scratch_operands = 0 : i64, tpu.core_type = #tpu.core_type<tc>, window_params = [{transform_indices = @transform_0, window_bounds = array<i64: 256, 64>}, {transform_indices = @transform_1, window_bounds = array<i64: 256, 8>}, {pipeline_mode = #tpu.pipeline_mode<synchronous>, transform_indices = @transform_2, window_bounds = array<i64: 168, 32>}, {pipeline_mode = #tpu.pipeline_mode<synchronous>, transform_indices = @transform_3, window_bounds = array<i64: 3, 32>}, {transform_indices = @transform_4, window_bounds = array<i64: 256, 2>}]} {
    %c0 = arith.constant 0 : index
    %c0_0 = arith.constant 0 : index
    %0 = vector.load %arg2[%c0, %c0_0] : memref<256x8xf32, #tpu.memory_space<vmem>>, vector<256x8xf32>
    %c0_1 = arith.constant 0 : index
    %c0_2 = arith.constant 0 : index
    %1 = vector.load %arg3[%c0_1, %c0_2] : memref<168x32xf32, #tpu.memory_space<vmem>>, vector<8x32xf32>
    %cst = arith.constant dense<0.000000e+00> : vector<256x32xf32>
    %2 = tpu.matmul %0, %1, %cst {dimension_numbers = #tpu.dot_dimension_numbers<[1], [0], [0], [1], [0, 0, 1, 1], [], []>} : vector<256x8xf32>, vector<8x32xf32>, vector<256x32xf32> -> vector<256x32xf32>
    %c0_3 = arith.constant 0 : index
    %c0_4 = arith.constant 0 : index
    %3 = vector.load %arg4[%c0_3, %c0_4] : memref<3x32xf32, #tpu.memory_space<vmem>>, vector<1x32xf32>
    %4 = vector.broadcast %3 : vector<1x32xf32> to vector<256x32xf32>
    %5 = arith.addf %2, %4 : vector<256x32xf32>
    %cst_5 = arith.constant 0.000000e+00 : f32
    %6 = vector.broadcast %cst_5 : f32 to vector<256x32xf32>
    %7 = arith.maximumf %5, %6 : vector<256x32xf32>
    %8 = vector.extract_strided_slice %0 {offsets = [0, 7], sizes = [256, 1], strides = [1, 1]} : vector<256x8xf32> to vector<256x1xf32>
    %9 = arith.fptosi %8 : vector<256x1xf32> to vector<256x1xi32>
    %10 = tpu.iota {dimensions = array<i32: 1>} : vector<256x32xi32>
    %11 = vector.broadcast %9 : vector<256x1xi32> to vector<256x32xi32>
    %12 = arith.cmpi eq, %10, %11 : vector<256x32xi32>
    %13 = arith.extui %12 : vector<256x32xi1> to vector<256x32xi32>
    %14 = arith.sitofp %13 : vector<256x32xi32> to vector<256x32xf32>
    %c0_6 = arith.constant 0 : index
    %c0_7 = arith.constant 0 : index
    %15 = vector.load %arg1[%c0_6, %c0_7] : memref<256x64xf32, #tpu.memory_space<vmem>>, vector<256x64xf32>
    %c8 = arith.constant 8 : index
    %c0_8 = arith.constant 0 : index
    %16 = vector.load %arg3[%c8, %c0_8] : memref<168x32xf32, #tpu.memory_space<vmem>>, vector<64x32xf32>
    %cst_9 = arith.constant dense<0.000000e+00> : vector<256x32xf32>
    %17 = tpu.matmul %15, %16, %cst_9 {dimension_numbers = #tpu.dot_dimension_numbers<[1], [0], [0], [1], [0, 0, 1, 1], [], []>} : vector<256x64xf32>, vector<64x32xf32>, vector<256x32xf32> -> vector<256x32xf32>
    %c72 = arith.constant 72 : index
    %c0_10 = arith.constant 0 : index
    %18 = vector.load %arg3[%c72, %c0_10] : memref<168x32xf32, #tpu.memory_space<vmem>>, vector<32x32xf32>
    %cst_11 = arith.constant dense<0.000000e+00> : vector<256x32xf32>
    %19 = tpu.matmul %7, %18, %cst_11 {dimension_numbers = #tpu.dot_dimension_numbers<[1], [0], [0], [1], [0, 0, 1, 1], [], []>} : vector<256x32xf32>, vector<32x32xf32>, vector<256x32xf32> -> vector<256x32xf32>
    %20 = arith.addf %17, %19 : vector<256x32xf32>
    %c104 = arith.constant 104 : index
    %c0_12 = arith.constant 0 : index
    %21 = vector.load %arg3[%c104, %c0_12] : memref<168x32xf32, #tpu.memory_space<vmem>>, vector<32x32xf32>
    %cst_13 = arith.constant dense<0.000000e+00> : vector<256x32xf32>
    %22 = tpu.matmul %14, %21, %cst_13 {dimension_numbers = #tpu.dot_dimension_numbers<[1], [0], [0], [1], [0, 0, 1, 1], [], []>} : vector<256x32xf32>, vector<32x32xf32>, vector<256x32xf32> -> vector<256x32xf32>
    %23 = arith.addf %20, %22 : vector<256x32xf32>
    %c1 = arith.constant 1 : index
    %c0_14 = arith.constant 0 : index
    %24 = vector.load %arg4[%c1, %c0_14] : memref<3x32xf32, #tpu.memory_space<vmem>>, vector<1x32xf32>
    %25 = vector.broadcast %24 : vector<1x32xf32> to vector<256x32xf32>
    %26 = arith.addf %23, %25 : vector<256x32xf32>
    %cst_15 = arith.constant 0.000000e+00 : f32
    %27 = vector.broadcast %cst_15 : f32 to vector<256x32xf32>
    %28 = arith.maximumf %26, %27 : vector<256x32xf32>
    %c136 = arith.constant 136 : index
    %c0_16 = arith.constant 0 : index
    %29 = vector.load %arg3[%c136, %c0_16] : memref<168x32xf32, #tpu.memory_space<vmem>>, vector<32x32xf32>
    %cst_17 = arith.constant dense<0.000000e+00> : vector<256x32xf32>
    %30 = tpu.matmul %28, %29, %cst_17 {dimension_numbers = #tpu.dot_dimension_numbers<[1], [0], [0], [1], [0, 0, 1, 1], [], []>} : vector<256x32xf32>, vector<32x32xf32>, vector<256x32xf32> -> vector<256x32xf32>
    %31 = vector.extract_strided_slice %30 {offsets = [0, 0], sizes = [256, 2], strides = [1, 1]} : vector<256x32xf32> to vector<256x2xf32>
    %c2 = arith.constant 2 : index
    %c0_18 = arith.constant 0 : index
    %32 = vector.load %arg4[%c2, %c0_18] : memref<3x32xf32, #tpu.memory_space<vmem>>, vector<1x2xf32>
    %33 = vector.broadcast %32 : vector<1x2xf32> to vector<256x2xf32>
    %34 = arith.addf %31, %33 : vector<256x2xf32>
    %c0_19 = arith.constant 0 : index
    %c0_20 = arith.constant 0 : index
    %35 = vector.load %arg5[%c0_19, %c0_20] : memref<256x2xf32, #tpu.memory_space<vmem>>, vector<256x2xf32>
    tpu.vector_store %arg5[%c0_19, %c0_20], %34 {strides = array<i32>} : memref<256x2xf32, #tpu.memory_space<vmem>>, vector<256x2xf32>,
    return
  }
  func.func @transform_0(%arg0: i32) -> (i32, i32) {
    %c0_i32 = arith.constant 0 : i32
    %c0_i32_0 = arith.constant 0 : i32
    return %arg0, %c0_i32 : i32, i32
  }
  func.func @transform_1(%arg0: i32) -> (i32, i32) {
    %c0_i32 = arith.constant 0 : i32
    %c0_i32_0 = arith.constant 0 : i32
    return %arg0, %c0_i32 : i32, i32
  }
  func.func @transform_2(%arg0: i32) -> (i32, i32) {
    %c0_i32 = arith.constant 0 : i32
    %c0_i32_0 = arith.constant 0 : i32
    %c0_i32_1 = arith.constant 0 : i32
    return %c0_i32, %c0_i32_0 : i32, i32
  }
  func.func @transform_3(%arg0: i32) -> (i32, i32) {
    %c0_i32 = arith.constant 0 : i32
    %c0_i32_0 = arith.constant 0 : i32
    %c0_i32_1 = arith.constant 0 : i32
    return %c0_i32, %c0_i32_0 : i32, i32
  }
  func.func @transform_4(%arg0: i32) -> (i32, i32) {
    %c0_i32 = arith.constant 0 : i32
    %c0_i32_0 = arith.constant 0 : i32
    return %arg0, %c0_i32 : i32, i32
  }
}

</mosaic_0001>

<bundles_post_ra>
// kernel: head.1
= control target key start
LH: loop header
LB: loop body
LE: loop exit
PB: predicated region body
PF: predicated region fallthrough
CT: control target
= control target key end

     0   :  { %vm55_vm0 = vcmask 64512   ;;  %v2876_v3 = vmov 7   ;;  %vm1001_vm1 = vcmask 523264   ;;  %vm679_vm2 = vcmask 261120   ;;  %s3843_s2 = inlined_call_operand.vmem [shape: f32[168,32], index: 2, kind: input, shape index: {}]   ;;  %s3844_s1 = inlined_call_operand.vmem [shape: f32[256,8], index: 1, kind: input, shape index: {}]   ;;  %s3845_s0 = inlined_call_operand.vmem [shape: f32[256,64], index: 0, kind: input, shape index: {}]   ;;  %s3846_s3 = inlined_call_operand.vmem [shape: f32[3,32], index: 3, kind: input, shape index: {}]   ;;  %s3847_s4 = inlined_call_operand.vmem [shape: f32[256,2], index: 4, kind: output, shape index: {}]  }
   0x1   :  { %v49_v0 = vld [vmem:[%s3843_s2] sm:$0xff]  ;;  %v18_v2 = vld [vmem:[%s3844_s1 + $0x8] sm:$0xff]  ;;  %2874 = vset.pattern.permute.xlu0 %v2876_v3  ;;  %2875 = vset.pattern.permute.xlu1 %v2876_v3  ;;  %v19_v5 = vld [vmem:[%s3844_s1 + $0x10] sm:$0xff] }
   0x2   :  { %v17_v1 = vld [vmem:[%s3844_s1] sm:$0xff]  ;;  %2524 = vmatprep.subr.mxu0 %v49_v0  ;;  %v20_v6 = vld [vmem:[%s3844_s1 + $0x18] sm:$0xff]  ;;  %v2810_v7 = vtrunc.f32 %v18_v2  ;;  %2806 = vmatprep.subr.mxu1 %v49_v0  ;;  %v2812_v8 = vtrunc.f32 %v19_v5  ;;  %v22_v13 = vld [vmem:[%s3844_s1 + $0x28] sm:$0xff] }
   0x3   :  { %2526 = vmatprep.mubr.msk.f32.mxu0 %vm55_vm0, %v17_v1  ;;  %v2808_v4 = vtrunc.f32 %v17_v1  ;;  %2525 = vmatpush3.msra.mxu0 %v49_v0  ;;  %v2814_v9 = vtrunc.f32 %v20_v6  ;;  %v21_v11 = vld [vmem:[%s3844_s1 + $0x20] sm:$0xff]  ;;  %v2937_v17 = vld [vmem:[%s3844_s1 + $0x88] sm:$0xff]  ;;  %v2942_v18 = vld [vmem:[%s3844_s1 + $0x90] sm:$0xff]  ;;  %v2818_v20 = vtrunc.f32 %v22_v13 }
   0x4   :  { %2527 = vmatmul.mubr.msk.f32.vlgmr.msra.gmra.mxu0 %vm55_vm0, %v18_v2  ;;  %2807 = vmatpush3.msra.mxu1 %v49_v0  ;;  %v2813_v12 = vcvt.f32.s32 %v2812_v8  ;;  %v2930_v14 = vld [vmem:[%s3844_s1 + $0x80] sm:$0xff]  ;;  %v2811_v15 = vcvt.f32.s32 %v2810_v7  ;;  %v2816_v16 = vtrunc.f32 %v21_v11  ;;  %v23_v21 = vld [vmem:[%s3844_s1 + $0x30] sm:$0xff]  ;;  %v2956_v22 = vld [vmem:[%s3844_s1 + $0x98] sm:$0xff]  ;;  %v2842_v8 = vtrunc.f32 %v2937_v17 }
   0x5   :  { %v2809_v10 = vcvt.f32.s32 %v2808_v4  ;;  %2529 = vmatprep.mubr.msk.f32.mxu0 %vm55_vm0, %v19_v5  ;;  %2550 = vmatprep.mubr.msk.f32.mxu1 %vm55_vm0, %v2930_v14  ;;  %v2815_v19 = vcvt.f32.s32 %v2814_v9  ;;  %v24_v23 = vld [vmem:[%s3844_s1 + $0x38] sm:$0xff]  ;;  %v2964_v24 = vld [vmem:[%s3844_s1 + $0xa0] sm:$0xff]  ;;  %v2820_v26 = vtrunc.f32 %v23_v21  ;;  %v2819_v27 = vcvt.f32.s32 %v2818_v20  ;;  %v2981_v31 = vld [vmem:[%s3844_s1 + $0xa8] sm:$0xff] }
   0x6   :  { %450 = vperm.xlu1 %2875, %v2813_v12   ;;  %2551 = vmatmul.mubr.msk.f32.vlgmr.msra.gmra.mxu1 %vm55_vm0, %v2937_v17  ;;  %v2817_v25 = vcvt.f32.s32 %v2816_v16  ;;  %v2822_v28 = vtrunc.f32 %v24_v23  ;;  %v678_v29 = vld [vmem:[%s3843_s2 + $0x60] sm:$0xff]  ;;  %v26_v32 = vld [vmem:[%s3844_s1 + $0x48] sm:$0xff]  ;;  %v2989_v33 = vld [vmem:[%s3844_s1 + $0xb0] sm:$0xff]  ;;  %v2840_v3 = vtrunc.f32 %v2930_v14  ;;  %v2843_v14 = vcvt.f32.s32 %v2842_v8 }
   0x7   :  { %444 = vperm.xlu0 %2874, %v2809_v10   ;;  %2553 = vmatprep.mubr.msk.f32.mxu1 %vm55_vm0, %v2942_v18  ;;  %v25_v30 = vld [vmem:[%s3844_s1 + $0x40] sm:$0xff]  ;;  %v2821_v34 = vcvt.f32.s32 %v2820_v26  ;;  %v2826_v37 = vtrunc.f32 %v26_v32  ;;  %v677_v38 = vld [vmem:[%s3843_s2 + $0x58] sm:$0xff]  ;;  %v27_v39 = vld [vmem:[%s3844_s1 + $0x50] sm:$0xff]  ;;  %v2848_v17 = vtrunc.f32 %v2964_v24  ;;  %v2850_v20 = vtrunc.f32 %v2981_v31 }
   0x8   :  { %2530 = vmatmul.mubr.msk.f32.gmra.mxu0 %vm55_vm0, %v20_v6  ;;  %v2824_v35 = vtrunc.f32 %v25_v30  ;;  %2574 = vmatprep.subr.mxu1 %v678_v29  ;;  %v2823_v36 = vcvt.f32.s32 %v2822_v28  ;;  %v3006_v40 = vld [vmem:[%s3844_s1 + $0xb8] sm:$0xff]  ;;  %v3014_v42 = vld [vmem:[%s3844_s1 + $0xc0] sm:$0xff]  ;;  %v2828_v44 = vtrunc.f32 %v27_v39  ;;  %v676_v47 = vld [vmem:[%s3843_s2 + $0x50] sm:$0xff]  ;;  %v2841_v12 = vcvt.f32.s32 %v2840_v3 }
   0x9   :  { %2532 = vmatprep.mubr.msk.f32.mxu0 %vm55_vm0, %v21_v11  ;;  %2575 = vmatpush3.msra.mxu1 %v678_v29  ;;  %v28_v41 = vld [vmem:[%s3844_s1 + $0x58] sm:$0xff]  ;;  %v2827_v45 = vcvt.f32.s32 %v2826_v37  ;;  %v29_v48 = vld [vmem:[%s3844_s1 + $0x60] sm:$0xff]  ;;  %v3031_v49 = vld [vmem:[%s3844_s1 + $0xc8] sm:$0xff]  ;;  %v2856_v26 = vtrunc.f32 %v3014_v42 }
   0xa   :  { %453 = vperm.xlu1 %2875, %v2815_v19   ;;  %2554 = vmatmul.mubr.msk.f32.gmra.mxu1 %vm55_vm0, %v2956_v22  ;;  %v2825_v43 = vcvt.f32.s32 %v2824_v35  ;;  %v2830_v46 = vtrunc.f32 %v28_v41  ;;  %v30_v50 = vld [vmem:[%s3844_s1 + $0x68] sm:$0xff]  ;;  %v3039_v51 = vld [vmem:[%s3844_s1 + $0xd0] sm:$0xff]  ;;  %v2829_v52 = vcvt.f32.s32 %v2828_v44  ;;  %v2832_v53 = vtrunc.f32 %v29_v48  ;;  %v674_v56 = vld [vmem:[%s3843_s2 + $0x40] sm:$0xff] }
   0xb   :  { %447 = vperm.xlu0 %2874, %v2811_v15   ;;  %2556 = vmatprep.mubr.msk.f32.mxu1 %vm55_vm0, %v2964_v24  ;;  %v2834_v55 = vtrunc.f32 %v30_v50  ;;  %v31_v57 = vld [vmem:[%s3844_s1 + $0x70] sm:$0xff]  ;;  %v3056_v58 = vld [vmem:[%s3844_s1 + $0xd8] sm:$0xff]  ;;  %v3064_v60 = vld [vmem:[%s3844_s1 + $0xe0] sm:$0xff]  ;;  %v2846_v15 = vtrunc.f32 %v2956_v22  ;;  %v2851_v22 = vcvt.f32.s32 %v2850_v20  ;;  %v2858_v24 = vtrunc.f32 %v3031_v49 }
   0xc   :  { %2533 = vmatmul.mubr.msk.f32.gmra.mxu0 %vm55_vm0, %v22_v13  ;;  %2576 = vmatprep.subr.mxu1 %v677_v38  ;;  %v2831_v54 = vcvt.f32.s32 %v2830_v46  ;;  %v32_v59 = vld [vmem:[%s3844_s1 + $0x78] sm:$0xff]  ;;  %v2833_v61 = vcvt.f32.s32 %v2832_v53  ;;  %v2836_v62 = vtrunc.f32 %v31_v57  ;;  %v3078_v2 = vld [vmem:[%s3844_s1 + $0xe8] sm:$0xff]  ;;  %v3084_v4 = vld [vmem:[%s3844_s1 + $0xf0] sm:$0xff]  ;;  %v2844_v13 = vtrunc.f32 %v2942_v18 }
   0xd   :  { %2535 = vmatprep.mubr.msk.f32.mxu0 %vm55_vm0, %v23_v21  ;;  %2577 = vmatpush3.msra.mxu1 %v677_v38  ;;  %v2835_v63 = vcvt.f32.s32 %v2834_v55  ;;  %v2838_v0 = vtrunc.f32 %v32_v59  ;;  %v673_v1 = vld [vmem:[%s3843_s2 + $0x38] sm:$0xff]  ;;  %v672_v6 = vld [vmem:[%s3843_s2 + $0x30] sm:$0xff]  ;;  %v671_v9 = vld [vmem:[%s3843_s2 + $0x28] sm:$0xff]  ;;  %v2847_v19 = vcvt.f32.s32 %v2846_v15  ;;  %v2849_v18 = vcvt.f32.s32 %v2848_v17 }
   0xe   :  { %459 = vperm.xlu1 %2875, %v2819_v27   ;;  %2557 = vmatmul.mubr.msk.f32.gmra.mxu1 %vm55_vm0, %v2981_v31  ;;  %v2837_v5 = vcvt.f32.s32 %v2836_v62  ;;  %v48_v10 = vld [vmem:[%s3844_s1 + $0xf8] sm:$0xff]  ;;  %v675_v11 = vld [vmem:[%s3843_s2 + $0x48] sm:$0xff]  ;;  %v2845_v16 = vcvt.f32.s32 %v2844_v13  ;;  %v2852_v21 = vtrunc.f32 %v2989_v33  ;;  %v2857_v28 = vcvt.f32.s32 %v2856_v26  ;;  %v668_v44 = vld [vmem:[%s3843_s2 + $0x10] sm:$0xff] }
   0xf   :  { %456 = vperm.xlu0 %2874, %v2817_v25   ;;  %2559 = vmatprep.mubr.msk.f32.mxu1 %vm55_vm0, %v2989_v33  ;;  %v2839_v7 = vcvt.f32.s32 %v2838_v0  ;;  %v2860_v29 = vtrunc.f32 %v3039_v51  ;;  %v2862_v31 = vtrunc.f32 %v3056_v58  ;;  %v2864_v33 = vtrunc.f32 %v3064_v60  ;;  %v635_v46 = vld [vmem:[%s3845_s0] sm:$0xff]  ;;  %v641_v53 = vld [vmem:[%s3845_s0 + $0x30] sm:$0xff]  ;;  %v650_v62 = vld [vmem:[%s3845_s0 + $0x78] sm:$0xff] }
  0x10   :  { %2536 = vmatmul.mubr.msk.f32.gmra.mxu0 %vm55_vm0, %v24_v23  ;;  %2578 = vmatprep.subr.mxu1 %v676_v47  ;;  %v2854_v23 = vtrunc.f32 %v3006_v40  ;;  %v2853_v25 = vcvt.f32.s32 %v2852_v21  ;;  %v2866_v35 = vtrunc.f32 %v3078_v2  ;;  %v2868_v37 = vtrunc.f32 %v3084_v4  ;;  %v643_v55 = vld [vmem:[%s3845_s0 + $0x40] sm:$0xff]  ;;  %v652_v0 = vld [vmem:[%s3845_s0 + $0x88] sm:$0xff]  ;;  %v665_v13 = vld [vmem:[%s3845_s0 + $0xf0] sm:$0xff] }
  0x11   :  { %2538 = vmatprep.mubr.msk.f32.mxu0 %vm55_vm0, %v25_v30  ;;  %2579 = vmatpush3.msra.mxu1 %v676_v47  ;;  %v2859_v30 = vcvt.f32.s32 %v2858_v24  ;;  %v636_v47 = vld [vmem:[%s3845_s0 + $0x8] sm:$0xff]  ;;  %v655_v3 = vld [vmem:[%s3845_s0 + $0xa0] sm:$0xff] }
  0x12   :  { %465 = vperm.xlu1 %2875, %v2823_v36   ;;  %2560 = vmatmul.mubr.msk.f32.gmra.mxu1 %vm55_vm0, %v3006_v40  ;;  %v2855_v27 = vcvt.f32.s32 %v2854_v23  ;;  %v2865_v36 = vcvt.f32.s32 %v2864_v33  ;;  %v2867_v38 = vcvt.f32.s32 %v2866_v35  ;;  %v2869_v40 = vcvt.f32.s32 %v2868_v37  ;;  %v660_v8 = vld [vmem:[%s3845_s0 + $0xc8] sm:$0xff]  ;;  %v3267_v15 = vld [vmem:[%s3846_s3] ss:$0 sm:$0xff] }
  0x13   :  { %462 = vperm.xlu0 %2874, %v2821_v34   ;;  %2562 = vmatprep.mubr.msk.f32.mxu1 %vm55_vm0, %v3014_v42  ;;  %v2863_v34 = vcvt.f32.s32 %v2862_v31  ;;  %v670_v42 = vld [vmem:[%s3843_s2 + $0x20] sm:$0xff] }
  0x14   :  { %2539 = vmatmul.mubr.msk.f32.gmra.mxu0 %vm55_vm0, %v26_v32  ;;  %2630 = vmatprep.subr.mxu0 %v674_v56  ;;  %v2861_v32 = vcvt.f32.s32 %v2860_v29 }
  0x15   :  { %2541 = vmatprep.mubr.msk.f32.mxu0 %vm55_vm0, %v27_v39  ;;  %2631 = vmatpush3.msra.mxu0 %v674_v56  ;;  %v2870_v39 = vtrunc.f32 %v48_v10  ;;  %v644_v56 = vld [vmem:[%s3845_s0 + $0x48] sm:$0xff] }
  0x16   :  { %471 = vperm.xlu1 %2875, %v2827_v45   ;;  %2563 = vmatmul.mubr.msk.f32.gmra.mxu1 %vm55_vm0, %v3031_v49  ;;  %v667_v45 = vld [vmem:[%s3843_s2 + $0x8] sm:$0xff]  ;;  %v637_v49 = vld [vmem:[%s3845_s0 + $0x10] sm:$0xff] }
  0x17   :  { %468 = vperm.xlu0 %2874, %v2825_v43   ;;  %2565 = vmatprep.mubr.msk.f32.mxu1 %vm55_vm0, %v3039_v51  ;;  %v669_v43 = vld [vmem:[%s3843_s2 + $0x18] sm:$0xff]  ;;  %v639_v51 = vld [vmem:[%s3845_s0 + $0x20] sm:$0xff] }
  0x18   :  { %2542 = vmatmul.mubr.msk.f32.gmra.mxu0 %vm55_vm0, %v28_v41  ;;  %2632 = vmatprep.subr.mxu0 %v673_v1  ;;  %v2871_v41 = vcvt.f32.s32 %v2870_v39 }
  0x19   :  { %2544 = vmatprep.mubr.msk.f32.mxu0 %vm55_vm0, %v29_v48  ;;  %2633 = vmatpush3.msra.mxu0 %v673_v1  ;;  %v3141_v48 = vld [vmem:[%s3843_s2 + $0x80] sm:$0xff]  ;;  %v653_v1 = vld [vmem:[%s3845_s0 + $0x90] sm:$0xff] }
  0x1a   :  { %477 = vperm.xlu1 %2875, %v2831_v54   ;;  %2566 = vmatmul.mubr.msk.f32.gmra.mxu1 %vm55_vm0, %v3056_v58  ;;  %v642_v54 = vld [vmem:[%s3845_s0 + $0x38] sm:$0xff] }
  0x1b   :  { %474 = vperm.xlu0 %2874, %v2829_v52   ;;  %2568 = vmatprep.mubr.msk.f32.mxu1 %vm55_vm0, %v3064_v60  ;;  %v640_v52 = vld [vmem:[%s3845_s0 + $0x28] sm:$0xff]  ;;  %v646_v58 = vld [vmem:[%s3845_s0 + $0x58] sm:$0xff] }
  0x1c   :  { %2545 = vmatmul.mubr.msk.f32.gmra.mxu0 %vm55_vm0, %v30_v50  ;;  %2634 = vmatprep.subr.mxu0 %v672_v6  ;;  %v638_v50 = vld [vmem:[%s3845_s0 + $0x18] sm:$0xff]  ;;  %v648_v60 = vld [vmem:[%s3845_s0 + $0x68] sm:$0xff] }
  0x1d   :  { %2547 = vmatprep.mubr.msk.f32.mxu0 %vm55_vm0, %v31_v57  ;;  %2635 = vmatpush3.msra.mxu0 %v672_v6  ;;  %v645_v57 = vld [vmem:[%s3845_s0 + $0x50] sm:$0xff]  ;;  %v658_v6 = vld [vmem:[%s3845_s0 + $0xb8] sm:$0xff] }
  0x1e   :  { %483 = vperm.xlu1 %2875, %v2835_v63   ;;  %2569 = vmatmul.mubr.msk.f32.gmra.mxu1 %vm55_vm0, %v3078_v2  ;;  %v651_v63 = vld [vmem:[%s3845_s0 + $0x80] sm:$0xff]  ;;  %v654_v2 = vld [vmem:[%s3845_s0 + $0x98] sm:$0xff] }
  0x1f   :  { %480 = vperm.xlu0 %2874, %v2833_v61   ;;  %2571 = vmatprep.mubr.msk.f32.mxu1 %vm55_vm0, %v3084_v4  ;;  %v649_v61 = vld [vmem:[%s3845_s0 + $0x70] sm:$0xff]  ;;  %v656_v4 = vld [vmem:[%s3845_s0 + $0xa8] sm:$0xff] }
  0x20   :  { %2548 = vmatmul.mubr.msk.f32.gmra.mxu0 %vm55_vm0, %v32_v59  ;;  %2636 = vmatprep.subr.mxu0 %v671_v9  ;;  %v647_v59 = vld [vmem:[%s3845_s0 + $0x60] sm:$0xff] }
  0x21   :  { %2580 = vmatprep.subr.mxu1 %v675_v11  ;;  %2637 = vmatpush3.msra.mxu0 %v671_v9  ;;  %v661_v9 = vld [vmem:[%s3845_s0 + $0xd0] sm:$0xff] }
  0x22   :  { %489 = vperm.xlu1 %2875, %v2839_v7   ;;  %2572 = vmatmul.mubr.msk.f32.gmra.mxu1 %vm55_vm0, %v48_v10  ;;  %v659_v7 = vld [vmem:[%s3845_s0 + $0xc0] sm:$0xff]  ;;  %v662_v10 = vld [vmem:[%s3845_s0 + $0xd8] sm:$0xff] }
  0x23   :  { %486 = vperm.xlu0 %2874, %v2837_v5   ;;  %2581 = vmatpush3.msra.mxu1 %v675_v11  ;;  %v657_v5 = vld [vmem:[%s3845_s0 + $0xb0] sm:$0xff]  ;;  %v663_v11 = vld [vmem:[%s3845_s0 + $0xe0] sm:$0xff] }
  0x24   :  { %2638 = vmatprep.subr.mxu0 %v670_v42  ;;  %2646 = vmatprep.mubr.msk.f32.mxu0 %vm1001_vm1, %v635_v46 }
  0x25   :  { %2639 = vmatpush3.msra.mxu0 %v670_v42  ;;  %2694 = vmatprep.subr.mxu1 %v3141_v48 }
  0x26   :  { %495 = vperm.xlu1 %2875, %v2843_v14   ;;  %2640 = vmatprep.subr.mxu0 %v669_v43  ;;  %v666_v14 = vld [vmem:[%s3845_s0 + $0xf8] sm:$0xff] }
  0x27   :  { %492 = vperm.xlu0 %2874, %v2841_v12   ;;  %2641 = vmatpush3.msra.mxu0 %v669_v43  ;;  %v664_v12 = vld [vmem:[%s3845_s0 + $0xe8] sm:$0xff] }
  0x28   :  { %2642 = vmatprep.subr.mxu0 %v668_v44 }
  0x29   :  { %2643 = vmatpush3.msra.mxu0 %v668_v44 }
  0x2a   :  { %501 = vperm.xlu1 %2875, %v2847_v19   ;;  %2644 = vmatprep.subr.mxu0 %v667_v45 }
  0x2b   :  { %498 = vperm.xlu0 %2874, %v2845_v16   ;;  %2645 = vmatpush3.msra.mxu0 %v667_v45 }
  0x2c   :  { %2647 = vmatmul.mubr.msk.f32.vlgmr.msra.gmra.mxu0 %vm1001_vm1, %v636_v47 }
  0x2d   :  { %2649 = vmatprep.mubr.msk.f32.mxu0 %vm1001_vm1, %v637_v49 }
  0x2e   :  { %507 = vperm.xlu1 %2875, %v2851_v22  }
  0x2f   :  { %504 = vperm.xlu0 %2874, %v2849_v18  }
  0x30   :  { %2650 = vmatmul.mubr.msk.f32.gmra.mxu0 %vm1001_vm1, %v638_v50 }
  0x31   :  { %2652 = vmatprep.mubr.msk.f32.mxu0 %vm1001_vm1, %v639_v51 }
  0x32   :  { %513 = vperm.xlu1 %2875, %v2855_v27  }
  0x33   :  { %510 = vperm.xlu0 %2874, %v2853_v25  }
  0x34   :  { %2653 = vmatmul.mubr.msk.f32.gmra.mxu0 %vm1001_vm1, %v640_v52 }
  0x35   :  { %2655 = vmatprep.mubr.msk.f32.mxu0 %vm1001_vm1, %v641_v53 }
  0x36   :  { %519 = vperm.xlu1 %2875, %v2859_v30  }
  0x37   :  { %516 = vperm.xlu0 %2874, %v2857_v28   ;;  %v1325_v28 = vld [vmem:[%s3843_s2 + $0x78] sm:$0xff] }
  0x38   :  { %2656 = vmatmul.mubr.msk.f32.gmra.mxu0 %vm1001_vm1, %v642_v54 }
  0x39   :  { %2658 = vmatprep.mubr.msk.f32.mxu0 %vm1001_vm1, %v643_v55 }
  0x3a   :  { %525 = vperm.xlu1 %2875, %v2863_v34  }
  0x3b   :  { %522 = vperm.xlu0 %2874, %v2861_v32   ;;  %v1324_v32 = vld [vmem:[%s3843_s2 + $0x70] sm:$0xff] }
  0x3c   :  { %2659 = vmatmul.mubr.msk.f32.gmra.mxu0 %vm1001_vm1, %v644_v56 }
  0x3d   :  { %2661 = vmatprep.mubr.msk.f32.mxu0 %vm1001_vm1, %v645_v57 }
  0x3e   :  { %531 = vperm.xlu1 %2875, %v2867_v38   ;;  %v1323_v38 = vld [vmem:[%s3843_s2 + $0x68] sm:$0xff] }
  0x3f   :  { %528 = vperm.xlu0 %2874, %v2865_v36  }
  0x40   :  { %2662 = vmatmul.mubr.msk.f32.gmra.mxu0 %vm1001_vm1, %v646_v58 }
  0x41   :  { %2664 = vmatprep.mubr.msk.f32.mxu0 %vm1001_vm1, %v647_v59 }
  0x42   :  { %537 = vperm.xlu1 %2875, %v2871_v41  }
  0x43   :  { %534 = vperm.xlu0 %2874, %v2869_v40  }
  0x44   :  { %2665 = vmatmul.mubr.msk.f32.gmra.mxu0 %vm1001_vm1, %v648_v60 }
  0x45   :  { %2667 = vmatprep.mubr.msk.f32.mxu0 %vm1001_vm1, %v649_v61 }
  0x48   :  { %2668 = vmatmul.mubr.msk.f32.gmra.mxu0 %vm1001_vm1, %v650_v62 }
  0x49   :  { %2670 = vmatprep.mubr.msk.f32.mxu0 %vm1001_vm1, %v651_v63 }
  0x4c   :  { %2671 = vmatmul.mubr.msk.f32.gmra.mxu0 %vm1001_vm1, %v652_v0 }
  0x4d   :  { %2673 = vmatprep.mubr.msk.f32.mxu0 %vm1001_vm1, %v653_v1 }
  0x50   :  { %2674 = vmatmul.mubr.msk.f32.gmra.mxu0 %vm1001_vm1, %v654_v2 }
  0x51   :  { %2676 = vmatprep.mubr.msk.f32.mxu0 %vm1001_vm1, %v655_v3 }
  0x54   :  { %2677 = vmatmul.mubr.msk.f32.gmra.mxu0 %vm1001_vm1, %v656_v4 }
  0x55   :  { %2679 = vmatprep.mubr.msk.f32.mxu0 %vm1001_vm1, %v657_v5 }
  0x58   :  { %2680 = vmatmul.mubr.msk.f32.gmra.mxu0 %vm1001_vm1, %v658_v6 }
  0x59   :  { %2682 = vmatprep.mubr.msk.f32.mxu0 %vm1001_vm1, %v659_v7 }
  0x5c   :  { %2683 = vmatmul.mubr.msk.f32.gmra.mxu0 %vm1001_vm1, %v660_v8 }
  0x5d   :  { %2685 = vmatprep.mubr.msk.f32.mxu0 %vm1001_vm1, %v661_v9 }
  0x60   :  { %2686 = vmatmul.mubr.msk.f32.gmra.mxu0 %vm1001_vm1, %v662_v10 }
  0x61   :  { %2688 = vmatprep.mubr.msk.f32.mxu0 %vm1001_vm1, %v663_v11 }
  0x64   :  { %2689 = vmatmul.mubr.msk.f32.gmra.mxu0 %vm1001_vm1, %v664_v12 }
  0x65   :  { %2691 = vmatprep.mubr.msk.f32.mxu0 %vm1001_vm1, %v665_v13 }
  0x68   :  { %2692 = vmatmul.mubr.msk.f32.gmra.mxu0 %vm1001_vm1, %v666_v14 }
  0x82   :  { %v3320_v12 = vpop.permute.xlu0 %444 }
  0xc4   :  { %v2528_v16 = vpop.f32.mrf.mxu0 }
  0xc5   :  { %v224_v17 = vadd.f32 %v2528_v16, %v3267_v15 }
  0xc6   :  { %v218_v19 = vpop.f32.mrf.mxu0  ;;  %v3271_v21 = vpop.f32.mrf.mxu1 }
  0xc7   :  { %v219_v20 = vadd.f32 %v3267_v15, %v218_v19  ;;  %v378_v23 = vmax.f32 %v224_v17, 0.0  ;;  %v304_v19 = vadd.f32 %v3271_v21, %v3267_v15 }
  0xc8   :  { %v2531_v18 = vpop.f32.mrf.mxu0  ;;  %v3274_v27 = vpop.f32.mrf.mxu1 }
  0xc9   :  { %v377_v22 = vmax.f32 %v219_v20, 0.0  ;;  %v234_v25 = vadd.f32 %v2531_v18, %v3267_v15  ;;  %v299_v6 = vadd.f32 %v3267_v15, %v3274_v27  ;;  %v3326_v18 = vpop.permute.xlu1 %450 }
  0xca   :  { %v228_v26 = vpop.f32.mrf.mxu0  ;;  %v3282_v30 = vpop.f32.mrf.mxu1 }
  0xcb   :  { %v229_v24 = vadd.f32 %v3267_v15, %v228_v26  ;;  %2582 = vmatprep.mubr.msk.f32.mxu1 %vm679_vm2, %v377_v22  ;;  %v380_v33 = vmax.f32 %v234_v25, 0.0  ;;  %v393_v14 = vmax.f32 %v299_v6, 0.0  ;;  %v3332_v25 = vpop.permute.xlu0 %447  ;;  %v394_v26 = vmax.f32 %v304_v19, 0.0 }
  0xcc   :  { %v2534_v29 = vpop.f32.mrf.mxu0  ;;  %2583 = vmatmul.mubr.msk.f32.vlgmr.msra.gmra.mxu1 %vm679_vm2, %v378_v23  ;;  %v308_v36 = vpop.f32.mrf.mxu1  ;;  %v314_v27 = vadd.f32 %v3282_v30, %v3267_v15 }
  0xcd   :  { %v379_v31 = vmax.f32 %v229_v24, 0.0  ;;  %2695 = vmatpush3.msra.mxu1 %v3141_v48  ;;  %v244_v34 = vadd.f32 %v2534_v29, %v3267_v15  ;;  %v309_v16 = vadd.f32 %v3267_v15, %v308_v36  ;;  %v3337_v21 = vpop.permute.xlu1 %453 }
  0xce   :  { %v238_v35 = vpop.f32.mrf.mxu0  ;;  %2696 = vmatprep.subr.mxu1 %v1325_v28  ;;  %v3295_v40 = vpop.f32.mrf.mxu1 }
  0xcf   :  { %v239_v37 = vadd.f32 %v3267_v15, %v238_v35  ;;  %2585 = vmatprep.mubr.msk.f32.mxu1 %vm679_vm2, %v379_v31  ;;  %2697 = vmatpush3.msra.mxu1 %v1325_v28  ;;  %v382_v42 = vmax.f32 %v244_v34, 0.0  ;;  %v395_v22 = vmax.f32 %v309_v16, 0.0  ;;  %v396_v31 = vmax.f32 %v314_v27, 0.0  ;;  %v3343_v34 = vpop.permute.xlu0 %456 }
  0xd0   :  { %v2537_v39 = vpop.f32.mrf.mxu0  ;;  %2586 = vmatmul.mubr.msk.f32.gmra.mxu1 %vm679_vm2, %v380_v33  ;;  %2698 = vmatprep.subr.mxu1 %v1324_v32  ;;  %v318_v45 = vpop.f32.mrf.mxu1 }
  0xd1   :  { %v381_v41 = vmax.f32 %v239_v37, 0.0  ;;  %2699 = vmatpush3.msra.mxu1 %v1324_v32  ;;  %v254_v43 = vadd.f32 %v2537_v39, %v3267_v15  ;;  %v319_v23 = vadd.f32 %v3267_v15, %v318_v45  ;;  %v324_v32 = vadd.f32 %v3295_v40, %v3267_v15  ;;  %v460_v39 = vpop.permute.xlu1 %459 }
  0xd2   :  { %v248_v44 = vpop.f32.mrf.mxu0  ;;  %2700 = vmatprep.subr.mxu1 %v1323_v38  ;;  %v3302_v52 = vpop.f32.mrf.mxu1 }
  0xd3   :  { %v249_v46 = vadd.f32 %v3267_v15, %v248_v44  ;;  %2588 = vmatprep.mubr.msk.f32.mxu1 %vm679_vm2, %v381_v41  ;;  %2701 = vmatpush3.msra.mxu1 %v1323_v38  ;;  %v384_v49 = vmax.f32 %v254_v43, 0.0  ;;  %v397_v28 = vmax.f32 %v319_v23, 0.0  ;;  %v398_v36 = vmax.f32 %v324_v32, 0.0 }
  0xd4   :  { %v2540_v47 = vpop.f32.mrf.mxu0  ;;  %2589 = vmatmul.mubr.msk.f32.gmra.mxu1 %vm679_vm2, %v382_v42  ;;  %v328_v59 = vpop.f32.mrf.mxu1  ;;  %v334_v37 = vadd.f32 %v3302_v52, %v3267_v15  ;;  %v441_v52 = vlaneseq }
  0xd5   :  { %v383_v48 = vmax.f32 %v249_v46, 0.0  ;;  %v264_v50 = vadd.f32 %v2540_v47, %v3267_v15  ;;  %v329_v29 = vadd.f32 %v3267_v15, %v328_v59  ;;  %v463_v42 = vpop.permute.xlu0 %462  ;;  %v466_v46 = vpop.permute.xlu1 %465 }
  0xd6   :  { %v258_v51 = vpop.f32.mrf.mxu0  ;;  %v2564_v2 = vpop.f32.mrf.mxu1  ;;  %v400_v43 = vmax.f32 %v334_v37, 0.0 }
  0xd7   :  { %v259_v53 = vadd.f32 %v3267_v15, %v258_v51  ;;  %2591 = vmatprep.mubr.msk.f32.mxu1 %vm679_vm2, %v383_v48  ;;  %v386_v56 = vmax.f32 %v264_v50, 0.0  ;;  %v399_v30 = vmax.f32 %v329_v29, 0.0  ;;  %v344_v44 = vadd.f32 %v2564_v2, %v3267_v15  ;;  %v1751_v29 = vld [vmem:[%s3843_s2 + $0x98] sm:$0xff] }
  0xd8   :  { %v2543_v54 = vpop.f32.mrf.mxu0  ;;  %2592 = vmatmul.mubr.msk.f32.gmra.mxu1 %vm679_vm2, %v384_v49  ;;  %v338_v10 = vpop.f32.mrf.mxu1 }
  0xd9   :  { %v385_v55 = vmax.f32 %v259_v53, 0.0  ;;  %v274_v57 = vadd.f32 %v2543_v54, %v3267_v15  ;;  %v339_v35 = vadd.f32 %v3267_v15, %v338_v10  ;;  %v402_v49 = vmax.f32 %v344_v44, 0.0  ;;  %v469_v53 = vpop.permute.xlu0 %468  ;;  %v472_v59 = vpop.permute.xlu1 %471  ;;  %v1750_v44 = vld [vmem:[%s3843_s2 + $0x90] sm:$0xff] }
  0xda   :  { %v268_v58 = vpop.f32.mrf.mxu0  ;;  %v2567_v20 = vpop.f32.mrf.mxu1 }
  0xdb   :  { %v269_v60 = vadd.f32 %v3267_v15, %v268_v58  ;;  %2594 = vmatprep.mubr.msk.f32.mxu1 %vm679_vm2, %v385_v55  ;;  %v388_v63 = vmax.f32 %v274_v57, 0.0  ;;  %v401_v41 = vmax.f32 %v339_v35, 0.0  ;;  %v354_v50 = vadd.f32 %v2567_v20, %v3267_v15 }
  0xdc   :  { %v2546_v61 = vpop.f32.mrf.mxu0  ;;  %2595 = vmatmul.mubr.msk.f32.gmra.mxu1 %vm679_vm2, %v386_v56  ;;  %v348_v24 = vpop.f32.mrf.mxu1  ;;  %v3362_v58 = vand.u32 127, %v441_v52 }
  0xdd   :  { %v387_v62 = vmax.f32 %v269_v60, 0.0  ;;  %v284_v0 = vadd.f32 %v2546_v61, %v3267_v15  ;;  %v349_v40 = vadd.f32 %v3267_v15, %v348_v24  ;;  %v404_v56 = vmax.f32 %v354_v50, 0.0  ;;  %v475_v61 = vpop.permute.xlu0 %474 }
  0xde   :  { %v278_v1 = vpop.f32.mrf.mxu0  ;;  %v2570_v33 = vpop.f32.mrf.mxu1  ;;  %vm539_vm3 = vcmp.eq.s32.totalorder %v3362_v58, %v3320_v12  ;;  %vm541_vm4 = vcmp.eq.s32.totalorder %v3362_v58, %v3326_v18  ;;  %vm540_vm5 = vcmp.eq.s32.totalorder %v3362_v58, %v3332_v25  ;;  %vm542_vm6 = vcmp.eq.s32.totalorder %v3362_v58, %v3337_v21 }
  0xdf   :  { %v279_v3 = vadd.f32 %v3267_v15, %v278_v1  ;;  %2597 = vmatprep.mubr.msk.f32.mxu1 %vm679_vm2, %v387_v62  ;;  %v390_v7 = vmax.f32 %v284_v0, 0.0  ;;  %v403_v47 = vmax.f32 %v349_v40, 0.0  ;;  %v364_v57 = vadd.f32 %v2570_v33, %v3267_v15  ;;  %v478_v0 = vpop.permute.xlu1 %477 }
  0xe0   :  { %v2549_v4 = vpop.f32.mrf.mxu0  ;;  %2598 = vmatmul.mubr.msk.f32.gmra.mxu1 %vm679_vm2, %v388_v63  ;;  %v358_v38 = vpop.f32.mrf.mxu1  ;;  %v2877_v1 = vmov 0.0   ;;  %vm543_vm7 = vcmp.eq.s32.totalorder %v3362_v58, %v3343_v34  ;;  %vm544_vm8 = vcmp.eq.s32.totalorder %v3362_v58, %v460_v39  ;;  %vm545_vm9 = vcmp.eq.s32.totalorder %v3362_v58, %v463_v42 }
  0xe1   :  { %v389_v5 = vmax.f32 %v279_v3, 0.0  ;;  %v294_v8 = vadd.f32 %v2549_v4, %v3267_v15  ;;  %v359_v48 = vadd.f32 %v3267_v15, %v358_v38  ;;  %v406_v62 = vmax.f32 %v364_v57, 0.0  ;;  %v481_v4 = vpop.permute.xlu0 %480  ;;  %v1749_v57 = vld [vmem:[%s3843_s2 + $0x88] sm:$0xff] }
  0xe2   :  { %v288_v9 = vpop.f32.mrf.mxu0  ;;  %v2573_v45 = vpop.f32.mrf.mxu1  ;;  %v2181_v2 = vsel %vm539_vm3, 1.0, %v2877_v1  ;;  %v2187_v12 = vsel %vm545_vm9, 1.0, %v2877_v1  ;;  %vm546_vm10 = vcmp.eq.s32.totalorder %v3362_v58, %v466_v46  ;;  %vm547_vm11 = vcmp.eq.s32.totalorder %v3362_v58, %v469_v53 }
  0xe3   :  { %v289_v11 = vadd.f32 %v3267_v15, %v288_v9  ;;  %2600 = vmatprep.mubr.msk.f32.mxu1 %vm679_vm2, %v389_v5  ;;  %v392_v17 = vmax.f32 %v294_v8, 0.0  ;;  %v405_v54 = vmax.f32 %v359_v48, 0.0  ;;  %v374_v63 = vadd.f32 %v2573_v45, %v3267_v15  ;;  %v484_v6 = vpop.permute.xlu1 %483 }
  0xe4   :  { %2601 = vmatmul.mubr.msk.f32.gmra.mxu1 %vm679_vm2, %v390_v7  ;;  %v368_v51 = vpop.f32.mrf.mxu1  ;;  %v2182_v5 = vsel %vm540_vm5, 1.0, %v2877_v1  ;;  %v2184_v8 = vsel %vm542_vm6, 1.0, %v2877_v1  ;;  %v2185_v9 = vsel %vm543_vm7, 1.0, %v2877_v1  ;;  %v2188_v16 = vsel %vm546_vm10, 1.0, %v2877_v1 }
  0xe5   :  { %v391_v13 = vmax.f32 %v289_v11, 0.0  ;;  %v369_v55 = vadd.f32 %v3267_v15, %v368_v51  ;;  %v408_v3 = vmax.f32 %v374_v63, 0.0  ;;  %v2183_v15 = vsel %vm541_vm4, 1.0, %v2877_v1  ;;  %v487_v7 = vpop.permute.xlu0 %486 }
  0xe6   :  { %v2186_v11 = vsel %vm544_vm8, 1.0, %v2877_v1  ;;  %v2189_v19 = vsel %vm547_vm11, 1.0, %v2877_v1  ;;  %vm548_vm12 = vcmp.eq.s32.totalorder %v3362_v58, %v472_v59  ;;  %vm549_vm13 = vcmp.eq.s32.totalorder %v3362_v58, %v475_v61 }
  0xe7   :  { %2603 = vmatprep.mubr.msk.f32.mxu1 %vm679_vm2, %v391_v13  ;;  %v407_v60 = vmax.f32 %v369_v55, 0.0  ;;  %v490_v10 = vpop.permute.xlu1 %489  ;;  %v2190_v18 = vsel %vm548_vm12, 1.0, %v2877_v1  ;;  %vm550_vm14 = vcmp.eq.s32.totalorder %v3362_v58, %v478_v0  ;;  %vm551_vm15 = vcmp.eq.s32.totalorder %v3362_v58, %v481_v4 }
  0xe8   :  { %2604 = vmatmul.mubr.msk.f32.gmra.mxu1 %vm679_vm2, %v392_v17  ;;  %v2192_v25 = vsel %vm550_vm14, 1.0, %v2877_v1  ;;  %vm552_vm0 = vcmp.eq.s32.totalorder %v3362_v58, %v484_v6  ;;  %vm553_vm1 = vcmp.eq.s32.totalorder %v3362_v58, %v487_v7  ;;  %vm554_vm3 = vcmp.eq.s32.totalorder %v3362_v58, %v490_v10 }
  0xe9   :  { %2606 = vmatprep.mubr.msk.f32.mxu1 %vm679_vm2, %v393_v14  ;;  %v493_v13 = vpop.permute.xlu0 %492  ;;  %v1752_v14 = vld [vmem:[%s3843_s2 + $0xa0] sm:$0xff]  ;;  %v2194_v24 = vsel %vm552_vm0, 1.0, %v2877_v1  ;;  %v2196_v32 = vsel %vm554_vm3, 1.0, %v2877_v1 }
  0xea   :  { %2750 = vmatprep.subr.mxu0 %v1752_v14  ;;  %vm555_vm4 = vcmp.eq.s32.totalorder %v3362_v58, %v493_v13 }
  0xeb   :  { %v496_v17 = vpop.permute.xlu1 %495  ;;  %2751 = vmatpush3.msra.mxu0 %v1752_v14  ;;  %v2197_v33 = vsel %vm555_vm4, 1.0, %v2877_v1 }
  0xec   :  { %2607 = vmatmul.mubr.msk.f32.gmra.mxu1 %vm679_vm2, %v394_v26  ;;  %v2193_v26 = vsel %vm551_vm15, 1.0, %v2877_v1  ;;  %2752 = vmatprep.subr.mxu0 %v1751_v29  ;;  %vm556_vm5 = vcmp.eq.s32.totalorder %v3362_v58, %v496_v17 }
  0xed   :  { %2609 = vmatprep.mubr.msk.f32.mxu1 %vm679_vm2, %v395_v22  ;;  %v499_v20 = vpop.permute.xlu0 %498  ;;  %v2191_v22 = vsel %vm549_vm13, 1.0, %v2877_v1  ;;  %2753 = vmatpush3.msra.mxu0 %v1751_v29 }
  0xee   :  { %vm557_vm6 = vcmp.eq.s32.totalorder %v3362_v58, %v499_v20  ;;  %2754 = vmatprep.subr.mxu0 %v1750_v44 }
  0xef   :  { %v502_v23 = vpop.permute.xlu1 %501  ;;  %v2199_v35 = vsel %vm557_vm6, 1.0, %v2877_v1  ;;  %2755 = vmatpush3.msra.mxu0 %v1750_v44 }
  0xf0   :  { %2610 = vmatmul.mubr.msk.f32.gmra.mxu1 %vm679_vm2, %v396_v31  ;;  %vm558_vm7 = vcmp.eq.s32.totalorder %v3362_v58, %v502_v23  ;;  %2756 = vmatprep.subr.mxu0 %v1749_v57 }
  0xf1   :  { %2612 = vmatprep.mubr.msk.f32.mxu1 %vm679_vm2, %v397_v28  ;;  %v505_v27 = vpop.permute.xlu0 %504  ;;  %v2195_v28 = vsel %vm553_vm1, 1.0, %v2877_v1  ;;  %v2200_v37 = vsel %vm558_vm7, 1.0, %v2877_v1  ;;  %2757 = vmatpush3.msra.mxu0 %v1749_v57 }
  0xf2   :  { %vm559_vm8 = vcmp.eq.s32.totalorder %v3362_v58, %v505_v27 }
  0xf3   :  { %v508_v21 = vpop.permute.xlu1 %507  ;;  %v2201_v39 = vsel %vm559_vm8, 1.0, %v2877_v1 }
  0xf4   :  { %2613 = vmatmul.mubr.msk.f32.gmra.mxu1 %vm679_vm2, %v398_v36  ;;  %vm560_vm9 = vcmp.eq.s32.totalorder %v3362_v58, %v508_v21 }
  0xf5   :  { %2615 = vmatprep.mubr.msk.f32.mxu1 %vm679_vm2, %v399_v30  ;;  %v511_v31 = vpop.permute.xlu0 %510  ;;  %v2198_v30 = vsel %vm556_vm5, 1.0, %v2877_v1  ;;  %v2202_v40 = vsel %vm560_vm9, 1.0, %v2877_v1  ;;  %vm2111_vm5 = vcmask 15360  }
  0xf6   :  { %vm561_vm10 = vcmp.eq.s32.totalorder %v3362_v58, %v511_v31 }
  0xf7   :  { %v514_v34 = vpop.permute.xlu1 %513  ;;  %v2203_v42 = vsel %vm561_vm10, 1.0, %v2877_v1 }
  0xf8   :  { %2616 = vmatmul.mubr.msk.f32.gmra.mxu1 %vm679_vm2, %v400_v43  ;;  %vm562_vm11 = vcmp.eq.s32.totalorder %v3362_v58, %v514_v34 }
  0xf9   :  { %2618 = vmatprep.mubr.msk.f32.mxu1 %vm679_vm2, %v401_v41  ;;  %v517_v36 = vpop.permute.xlu0 %516  ;;  %v2204_v45 = vsel %vm562_vm11, 1.0, %v2877_v1 }
  0xfa   :  { %vm563_vm12 = vcmp.eq.s32.totalorder %v3362_v58, %v517_v36 }
  0xfb   :  { %v520_v38 = vpop.permute.xlu1 %519  ;;  %v2205_v46 = vsel %vm563_vm12, 1.0, %v2877_v1 }
  0xfc   :  { %2619 = vmatmul.mubr.msk.f32.gmra.mxu1 %vm679_vm2, %v402_v49  ;;  %vm564_vm13 = vcmp.eq.s32.totalorder %v3362_v58, %v520_v38 }
  0xfd   :  { %2621 = vmatprep.mubr.msk.f32.mxu1 %vm679_vm2, %v403_v47  ;;  %v523_v41 = vpop.permute.xlu0 %522  ;;  %v2206_v48 = vsel %vm564_vm13, 1.0, %v2877_v1 }
  0xfe   :  { %vm565_vm14 = vcmp.eq.s32.totalorder %v3362_v58, %v523_v41 }
  0xff   :  { %v526_v43 = vpop.permute.xlu1 %525  ;;  %v2207_v50 = vsel %vm565_vm14, 1.0, %v2877_v1 }
 0x100   :  { %2622 = vmatmul.mubr.msk.f32.gmra.mxu1 %vm679_vm2, %v404_v56  ;;  %vm566_vm15 = vcmp.eq.s32.totalorder %v3362_v58, %v526_v43 }
 0x101   :  { %2624 = vmatprep.mubr.msk.f32.mxu1 %vm679_vm2, %v405_v54  ;;  %v529_v47 = vpop.permute.xlu0 %528  ;;  %v2208_v52 = vsel %vm566_vm15, 1.0, %v2877_v1 }
 0x102   :  { %vm567_vm0 = vcmp.eq.s32.totalorder %v3362_v58, %v529_v47 }
 0x103   :  { %v532_v49 = vpop.permute.xlu1 %531  ;;  %v2209_v53 = vsel %vm567_vm0, 1.0, %v2877_v1 }
 0x104   :  { %2625 = vmatmul.mubr.msk.f32.gmra.mxu1 %vm679_vm2, %v406_v62  ;;  %vm568_vm1 = vcmp.eq.s32.totalorder %v3362_v58, %v532_v49 }
 0x105   :  { %2627 = vmatprep.mubr.msk.f32.mxu1 %vm679_vm2, %v407_v60  ;;  %v535_v51 = vpop.permute.xlu0 %534  ;;  %v2210_v55 = vsel %vm568_vm1, 1.0, %v2877_v1  ;;  %v2648_v60 = vpop.f32.mrf.mxu0 }
 0x106   :  { %vm569_vm3 = vcmp.eq.s32.totalorder %v3362_v58, %v535_v51 }
 0x107   :  { %v538_v54 = vpop.permute.xlu1 %537  ;;  %v2211_v56 = vsel %vm569_vm3, 1.0, %v2877_v1  ;;  %v1164_v63 = vpop.f32.mrf.mxu0 }
 0x108   :  { %2628 = vmatmul.mubr.msk.f32.gmra.mxu1 %vm679_vm2, %v408_v3  ;;  %vm570_vm4 = vcmp.eq.s32.totalorder %v3362_v58, %v538_v54 }
 0x109   :  { %2702 = vmatprep.mubr.msk.f32.mxu1 %vm679_vm2, %v2181_v2  ;;  %v2212_v59 = vsel %vm570_vm4, 1.0, %v2877_v1  ;;  %v2651_v58 = vpop.f32.mrf.mxu0 }
 0x10b   :  { %v1174_v4 = vpop.f32.mrf.mxu0 }
 0x10c   :  { %2703 = vmatmul.mubr.msk.f32.vlgmr.msra.gmra.mxu1 %vm679_vm2, %v2182_v5 }
 0x10d   :  { %2705 = vmatprep.mubr.msk.f32.mxu1 %vm679_vm2, %v2183_v15  ;;  %v2654_v6 = vpop.f32.mrf.mxu0 }
 0x10f   :  { %v1184_v1 = vpop.f32.mrf.mxu0 }
 0x110   :  { %2706 = vmatmul.mubr.msk.f32.gmra.mxu1 %vm679_vm2, %v2184_v8 }
 0x111   :  { %2708 = vmatprep.mubr.msk.f32.mxu1 %vm679_vm2, %v2185_v9 }
 0x114   :  { %2709 = vmatmul.mubr.msk.f32.gmra.mxu1 %vm679_vm2, %v2186_v11  ;;  %v2657_v11 = vpop.f32.mrf.mxu0 }
 0x115   :  { %2711 = vmatprep.mubr.msk.f32.mxu1 %vm679_vm2, %v2187_v12 }
 0x116   :  { %v3497_v14 = vpop.f32.mrf.mxu0 }
 0x118   :  { %2712 = vmatmul.mubr.msk.f32.gmra.mxu1 %vm679_vm2, %v2188_v16 }
 0x119   :  { %2714 = vmatprep.mubr.msk.f32.mxu1 %vm679_vm2, %v2189_v19  ;;  %v3503_v19 = vpop.f32.mrf.mxu0 }
 0x11c   :  { %2715 = vmatmul.mubr.msk.f32.gmra.mxu1 %vm679_vm2, %v2190_v18 }
 0x11d   :  { %2717 = vmatprep.mubr.msk.f32.mxu1 %vm679_vm2, %v2191_v22  ;;  %v3509_v22 = vpop.f32.mrf.mxu0 }
 0x120   :  { %2718 = vmatmul.mubr.msk.f32.gmra.mxu1 %vm679_vm2, %v2192_v25 }
 0x121   :  { %2720 = vmatprep.mubr.msk.f32.mxu1 %vm679_vm2, %v2193_v26  ;;  %v3515_v26 = vpop.f32.mrf.mxu0 }
 0x123   :  { %v3521_v21 = vpop.f32.mrf.mxu0 }
 0x124   :  { %2721 = vmatmul.mubr.msk.f32.gmra.mxu1 %vm679_vm2, %v2194_v24 }
 0x125   :  { %2723 = vmatprep.mubr.msk.f32.mxu1 %vm679_vm2, %v2195_v28  ;;  %v3527_v31 = vpop.f32.mrf.mxu0 }
 0x127   :  { %v3533_v34 = vpop.f32.mrf.mxu0 }
 0x128   :  { %2724 = vmatmul.mubr.msk.f32.gmra.mxu1 %vm679_vm2, %v2196_v32 }
 0x129   :  { %2726 = vmatprep.mubr.msk.f32.mxu1 %vm679_vm2, %v2197_v33  ;;  %v3539_v36 = vpop.f32.mrf.mxu0 }
 0x12c   :  { %2727 = vmatmul.mubr.msk.f32.gmra.mxu1 %vm679_vm2, %v2198_v30 }
 0x12d   :  { %2729 = vmatprep.mubr.msk.f32.mxu1 %vm679_vm2, %v2199_v35 }
 0x130   :  { %2730 = vmatmul.mubr.msk.f32.gmra.mxu1 %vm679_vm2, %v2200_v37 }
 0x131   :  { %2732 = vmatprep.mubr.msk.f32.mxu1 %vm679_vm2, %v2201_v39  ;;  %v3545_v39 = vpop.f32.mrf.mxu0 }
 0x134   :  { %2733 = vmatmul.mubr.msk.f32.gmra.mxu1 %vm679_vm2, %v2202_v40 }
 0x135   :  { %2735 = vmatprep.mubr.msk.f32.mxu1 %vm679_vm2, %v2203_v42  ;;  %v3551_v42 = vpop.f32.mrf.mxu0 }
 0x137   :  { %v3560_v49 = vpop.f32.mrf.mxu0 }
 0x138   :  { %2736 = vmatmul.mubr.msk.f32.gmra.mxu1 %vm679_vm2, %v2204_v45 }
 0x139   :  { %2738 = vmatprep.mubr.msk.f32.mxu1 %vm679_vm2, %v2205_v46 }
 0x13c   :  { %2739 = vmatmul.mubr.msk.f32.gmra.mxu1 %vm679_vm2, %v2206_v48  ;;  %v3558_v48 = vld [vmem:[%s3846_s3 + $0x1] ss:$0 sm:$0xff] }
 0x13d   :  { %2741 = vmatprep.mubr.msk.f32.mxu1 %vm679_vm2, %v2207_v50 }
 0x140   :  { %2742 = vmatmul.mubr.msk.f32.gmra.mxu1 %vm679_vm2, %v2208_v52 }
 0x141   :  { %2744 = vmatprep.mubr.msk.f32.mxu1 %vm679_vm2, %v2209_v53 }
 0x144   :  { %2745 = vmatmul.mubr.msk.f32.gmra.mxu1 %vm679_vm2, %v2210_v55 }
 0x145   :  { %2747 = vmatprep.mubr.msk.f32.mxu1 %vm679_vm2, %v2211_v56 }
 0x148   :  { %2748 = vmatmul.mubr.msk.f32.gmra.mxu1 %vm679_vm2, %v2212_v59  ;;  %v3564_v59 = vpop.f32.mrf.mxu0 }
 0x18c   :  { %v2584_v61 = vpop.f32.mrf.mxu1 }
 0x18d   :  { %v1170_v44 = vadd.f32 %v2648_v60, %v2584_v61 }
 0x18e   :  { %v842_v62 = vpop.f32.mrf.mxu1 }
 0x18f   :  { %v1165_v46 = vadd.f32 %v1164_v63, %v842_v62 }
 0x190   :  { %v2587_v0 = vpop.f32.mrf.mxu1 }
 0x191   :  { %v1180_v51 = vadd.f32 %v2651_v58, %v2587_v0 }
 0x192   :  { %v852_v2 = vpop.f32.mrf.mxu1 }
 0x193   :  { %v1175_v55 = vadd.f32 %v1174_v4, %v852_v2  ;;  %v3569_v2 = vpop.f32.mrf.mxu0 }
 0x194   :  { %v2590_v3 = vpop.f32.mrf.mxu1 }
 0x195   :  { %v1190_v61 = vadd.f32 %v2654_v6, %v2590_v3 }
 0x196   :  { %v862_v15 = vpop.f32.mrf.mxu1 }
 0x198   :  { %v3483_v5 = vpop.f32.mrf.mxu1 }
 0x19a   :  { %v3485_v7 = vpop.f32.mrf.mxu1 }
 0x19c   :  { %v3487_v8 = vpop.f32.mrf.mxu1 }
 0x19e   :  { %v3489_v9 = vpop.f32.mrf.mxu1 }
 0x1a0   :  { %v3491_v10 = vpop.f32.mrf.mxu1 }
 0x1a2   :  { %v3493_v12 = vpop.f32.mrf.mxu1 }
 0x1a4   :  { %v3495_v13 = vpop.f32.mrf.mxu1 }
 0x1a6   :  { %v3499_v16 = vpop.f32.mrf.mxu1 }
 0x1a8   :  { %v3501_v17 = vpop.f32.mrf.mxu1 }
 0x1aa   :  { %v3505_v20 = vpop.f32.mrf.mxu1 }
 0x1ac   :  { %v3507_v18 = vpop.f32.mrf.mxu1 }
 0x1ae   :  { %v3511_v23 = vpop.f32.mrf.mxu1 }
 0x1b0   :  { %v3513_v25 = vpop.f32.mrf.mxu1 }
 0x1b2   :  { %v3517_v27 = vpop.f32.mrf.mxu1 }
 0x1b4   :  { %v3519_v24 = vpop.f32.mrf.mxu1 }
 0x1b6   :  { %v3523_v28 = vpop.f32.mrf.mxu1 }
 0x1b8   :  { %v3525_v29 = vpop.f32.mrf.mxu1 }
 0x1ba   :  { %v3529_v32 = vpop.f32.mrf.mxu1 }
 0x1bc   :  { %v3531_v33 = vpop.f32.mrf.mxu1 }
 0x1be   :  { %v3535_v30 = vpop.f32.mrf.mxu1 }
 0x1c0   :  { %v3537_v35 = vpop.f32.mrf.mxu1 }
 0x1c2   :  { %v3541_v37 = vpop.f32.mrf.mxu1 }
 0x1c4   :  { %v3543_v38 = vpop.f32.mrf.mxu1 }
 0x1c6   :  { %v3547_v41 = vpop.f32.mrf.mxu1 }
 0x1c8   :  { %v3549_v40 = vpop.f32.mrf.mxu1 }
 0x1c9   :  { %3848 = vst [vmem:[#allocation2_spill] sm:$0xff] %v3549_v40  ;;  %v1185_v40 = vadd.f32 %v1184_v1, %v862_v15  ;;  %v1195_v15 = vadd.f32 %v3497_v14, %v3485_v7  ;;  %v1205_v7 = vadd.f32 %v3509_v22, %v3489_v9  ;;  %v1215_v9 = vadd.f32 %v3521_v21, %v3493_v12 }
 0x1ca   :  { %v3553_v43 = vpop.f32.mrf.mxu1  ;;  %v1225_v12 = vadd.f32 %v3533_v34, %v3499_v16  ;;  %v1235_v16 = vadd.f32 %v3545_v39, %v3505_v20  ;;  %v1245_v20 = vadd.f32 %v3560_v49, %v3511_v23  ;;  %v1255_v23 = vadd.f32 %v3569_v2, %v3517_v27 }
 0x1cb   :  { %3849 = vst [vmem:[#allocation3_spill] sm:$0xff] %v3553_v43 }
 0x1cc   :  { %v2704_v45 = vpop.f32.mrf.mxu1 }
 0x1cd   :  { %v1649_v47 = vadd.f32 %v2704_v45, %v1170_v44 }
 0x1ce   :  { %v1489_v50 = vpop.f32.mrf.mxu1 }
 0x1cf   :  { %v1648_v52 = vadd.f32 %v1489_v50, %v1165_v46  ;;  %v1686_v53 = vadd.f32 %v3558_v48, %v1649_v47  ;;  %v1200_v46 = vadd.f32 %v2657_v11, %v3483_v5  ;;  %v1210_v5 = vadd.f32 %v3503_v19, %v3487_v8 }
 0x1d0   :  { %v2707_v54 = vpop.f32.mrf.mxu1  ;;  %v1220_v8 = vadd.f32 %v3515_v26, %v3491_v10  ;;  %v1230_v10 = vadd.f32 %v3527_v31, %v3495_v13  ;;  %v1240_v13 = vadd.f32 %v3539_v36, %v3501_v17  ;;  %v1250_v17 = vadd.f32 %v3551_v42, %v3507_v18 }
 0x1d1   :  { %v1685_v56 = vadd.f32 %v3558_v48, %v1648_v52  ;;  %v1651_v57 = vadd.f32 %v2707_v54, %v1180_v51  ;;  %v1718_v44 = vmax.f32 %v1686_v53, 0.0  ;;  %v3578_v52 = vpop.f32.mrf.mxu0  ;;  %v1260_v18 = vadd.f32 %v3564_v59, %v3513_v25 }
 0x1d2   :  { %v1499_v60 = vpop.f32.mrf.mxu1  ;;  %v1270_v25 = vadd.f32 %v3578_v52, %v3519_v24 }
 0x1d3   :  { %v1717_v62 = vmax.f32 %v1685_v56, 0.0  ;;  %v1650_v63 = vadd.f32 %v1499_v60, %v1175_v55  ;;  %v1688_v45 = vadd.f32 %v3558_v48, %v1651_v57  ;;  %v3588_v60 = vpop.f32.mrf.mxu0 }
 0x1d4   :  { %v2710_v43 = vpop.f32.mrf.mxu1  ;;  %v1265_v27 = vadd.f32 %v3588_v60, %v3523_v28 }
 0x1d5   :  { %v1687_v0 = vadd.f32 %v3558_v48, %v1650_v63  ;;  %v1653_v58 = vadd.f32 %v2710_v43, %v1190_v61  ;;  %2758 = vmatprep.mubr.msk.f32.mxu0 %vm679_vm2, %v1717_v62  ;;  %v1720_v47 = vmax.f32 %v1688_v45, 0.0 }
 0x1d6   :  { %v1509_v4 = vpop.f32.mrf.mxu1  ;;  %2759 = vmatmul.mubr.msk.f32.vlgmr.msra.gmra.mxu0 %vm679_vm2, %v1718_v44 }
 0x1d7   :  { %v1719_v3 = vmax.f32 %v1687_v0, 0.0  ;;  %v1652_v6 = vadd.f32 %v1509_v4, %v1185_v40  ;;  %v1690_v50 = vadd.f32 %v3558_v48, %v1653_v58  ;;  %v3598_v58 = vpop.f32.mrf.mxu0 }
 0x1d8   :  { %v2713_v51 = vpop.f32.mrf.mxu1  ;;  %v1280_v24 = vadd.f32 %v3598_v58, %v3525_v29 }
 0x1d9   :  { %v1689_v1 = vadd.f32 %v3558_v48, %v1652_v6  ;;  %v1655_v43 = vadd.f32 %v2713_v51, %v1200_v46  ;;  %2761 = vmatprep.mubr.msk.f32.mxu0 %vm679_vm2, %v1719_v3  ;;  %v1722_v54 = vmax.f32 %v1690_v50, 0.0  ;;  %v1274_v51 = vpop.f32.mrf.mxu0 }
 0x1da   :  { %v1519_v53 = vpop.f32.mrf.mxu1  ;;  %2762 = vmatmul.mubr.msk.f32.gmra.mxu0 %vm679_vm2, %v1720_v47  ;;  %v1275_v28 = vadd.f32 %v1274_v51, %v3529_v32 }
 0x1db   :  { %v1721_v11 = vmax.f32 %v1689_v1, 0.0  ;;  %v1654_v40 = vadd.f32 %v1519_v53, %v1195_v15  ;;  %v1692_v55 = vadd.f32 %v3558_v48, %v1655_v43 }
 0x1dc   :  { %v2716_v56 = vpop.f32.mrf.mxu1 }
 0x1dd   :  { %v1691_v14 = vadd.f32 %v3558_v48, %v1654_v40  ;;  %v1657_v57 = vadd.f32 %v2716_v56, %v1210_v5  ;;  %2764 = vmatprep.mubr.msk.f32.mxu0 %vm679_vm2, %v1721_v11  ;;  %v1724_v63 = vmax.f32 %v1692_v55, 0.0  ;;  %v2684_v40 = vpop.f32.mrf.mxu0 }
 0x1de   :  { %v1529_v61 = vpop.f32.mrf.mxu1  ;;  %2765 = vmatmul.mubr.msk.f32.gmra.mxu0 %vm679_vm2, %v1722_v54 }
 0x1df   :  { %v1723_v19 = vmax.f32 %v1691_v14, 0.0  ;;  %v1656_v62 = vadd.f32 %v1529_v61, %v1205_v7  ;;  %v1694_v44 = vadd.f32 %v3558_v48, %v1657_v57  ;;  %v1284_v61 = vpop.f32.mrf.mxu0 }
 0x1e0   :  { %v2719_v45 = vpop.f32.mrf.mxu1 }
 0x1e1   :  { %v1693_v22 = vadd.f32 %v3558_v48, %v1656_v62  ;;  %v1659_v0 = vadd.f32 %v2719_v45, %v1220_v8  ;;  %2767 = vmatprep.mubr.msk.f32.mxu0 %vm679_vm2, %v1723_v19  ;;  %v1726_v3 = vmax.f32 %v1694_v44, 0.0 }
 0x1e2   :  { %v1539_v4 = vpop.f32.mrf.mxu1  ;;  %2768 = vmatmul.mubr.msk.f32.gmra.mxu0 %vm679_vm2, %v1724_v63 }
 0x1e3   :  { %v1725_v26 = vmax.f32 %v1693_v22, 0.0  ;;  %v1658_v46 = vadd.f32 %v1539_v4, %v1215_v9  ;;  %v1696_v6 = vadd.f32 %v3558_v48, %v1659_v0  ;;  %v2687_v9 = vpop.f32.mrf.mxu0 }
 0x1e4   :  { %v2722_v47 = vpop.f32.mrf.mxu1 }
 0x1e5   :  { %v1695_v21 = vadd.f32 %v3558_v48, %v1658_v46  ;;  %v1661_v50 = vadd.f32 %v2722_v47, %v1230_v10  ;;  %2770 = vmatprep.mubr.msk.f32.mxu0 %vm679_vm2, %v1725_v26  ;;  %v1728_v43 = vmax.f32 %v1696_v6, 0.0 }
 0x1e6   :  { %v1549_v15 = vpop.f32.mrf.mxu1  ;;  %2771 = vmatmul.mubr.msk.f32.gmra.mxu0 %vm679_vm2, %v1726_v3  ;;  %v1294_v3 = vpop.f32.mrf.mxu0 }
 0x1e7   :  { %v1727_v31 = vmax.f32 %v1695_v21, 0.0  ;;  %v1660_v1 = vadd.f32 %v1549_v15, %v1225_v12  ;;  %v1698_v53 = vadd.f32 %v3558_v48, %v1661_v50 }
 0x1e8   :  { %v2725_v5 = vpop.f32.mrf.mxu1 }
 0x1e9   :  { %v1697_v34 = vadd.f32 %v3558_v48, %v1660_v1  ;;  %v1663_v11 = vadd.f32 %v2725_v5, %v1240_v13  ;;  %2773 = vmatprep.mubr.msk.f32.mxu0 %vm679_vm2, %v1727_v31  ;;  %v1730_v56 = vmax.f32 %v1698_v53, 0.0  ;;  %v2690_v13 = vpop.f32.mrf.mxu0  ;;  %v1290_v1 = vadd.f32 %v2684_v40, %v3531_v33 }
 0x1ea   :  { %v1559_v54 = vpop.f32.mrf.mxu1  ;;  %2774 = vmatmul.mubr.msk.f32.gmra.mxu0 %vm679_vm2, %v1728_v43 }
 0x1eb   :  { %v1729_v36 = vmax.f32 %v1697_v34, 0.0  ;;  %v1662_v55 = vadd.f32 %v1559_v54, %v1235_v16  ;;  %v1700_v7 = vadd.f32 %v3558_v48, %v1663_v11  ;;  %v1285_v16 = vadd.f32 %v1284_v61, %v3535_v30  ;;  %v1304_v34 = vpop.f32.mrf.mxu0 }
 0x1ec   :  { %v2728_v14 = vpop.f32.mrf.mxu1  ;;  %v1300_v54 = vadd.f32 %v2687_v9, %v3537_v35 }
 0x1ed   :  { %v1699_v39 = vadd.f32 %v3558_v48, %v1662_v55  ;;  %v1665_v57 = vadd.f32 %v2728_v14, %v1250_v17  ;;  %2776 = vmatprep.mubr.msk.f32.mxu0 %vm679_vm2, %v1729_v36  ;;  %v1732_v62 = vmax.f32 %v1700_v7, 0.0  ;;  %v2693_v14 = vpop.f32.mrf.mxu0 }
 0x1ee   :  { %v1569_v8 = vpop.f32.mrf.mxu1  ;;  %2777 = vmatmul.mubr.msk.f32.gmra.mxu0 %vm679_vm2, %v1730_v56  ;;  %v1295_v56 = vadd.f32 %v1294_v3, %v3541_v37 }
 0x1ef   :  { %v1731_v42 = vmax.f32 %v1699_v39, 0.0  ;;  %v1664_v19 = vadd.f32 %v1569_v8, %v1245_v20  ;;  %v1702_v63 = vadd.f32 %v3558_v48, %v1665_v57  ;;  %v1310_v39 = vadd.f32 %v2690_v13, %v3543_v38 }
 0x1f0   :  { %v2731_v44 = vpop.f32.mrf.mxu1 }
 0x1f1   :  { %v1701_v49 = vadd.f32 %v3558_v48, %v1664_v19  ;;  %v1667_v45 = vadd.f32 %v2731_v44, %v1260_v18  ;;  %2779 = vmatprep.mubr.msk.f32.mxu0 %vm679_vm2, %v1731_v42  ;;  %v1734_v4 = vmax.f32 %v1702_v63, 0.0  ;;  %v1305_v42 = vadd.f32 %v1304_v34, %v3547_v41  ;;  %v3850_v44 = vld [vmem:[#allocation2_spill] sm:$0xff] }
 0x1f2   :  { %v1579_v22 = vpop.f32.mrf.mxu1  ;;  %2780 = vmatmul.mubr.msk.f32.gmra.mxu0 %vm679_vm2, %v1732_v62  ;;  %v1314_v62 = vpop.f32.mrf.mxu0 }
 0x1f3   :  { %v1733_v59 = vmax.f32 %v1701_v49, 0.0  ;;  %v1666_v0 = vadd.f32 %v1579_v22, %v1255_v23  ;;  %v1704_v10 = vadd.f32 %v3558_v48, %v1667_v45  ;;  %v1320_v23 = vadd.f32 %v2693_v14, %v3850_v44 }
 0x1f4   :  { %v2734_v26 = vpop.f32.mrf.mxu1 }
 0x1f5   :  { %v1703_v2 = vadd.f32 %v3558_v48, %v1666_v0  ;;  %v1669_v46 = vadd.f32 %v2734_v26, %v1270_v25  ;;  %2782 = vmatprep.mubr.msk.f32.mxu0 %vm679_vm2, %v1733_v59  ;;  %v1736_v12 = vmax.f32 %v1704_v10, 0.0  ;;  %v3851_v25 = vld [vmem:[#allocation3_spill] sm:$0xff] }
 0x1f6   :  { %v1589_v6 = vpop.f32.mrf.mxu1  ;;  %2783 = vmatmul.mubr.msk.f32.gmra.mxu0 %vm679_vm2, %v1734_v4  ;;  %v1315_v59 = vadd.f32 %v1314_v62, %v3851_v25 }
 0x1f7   :  { %v1735_v52 = vmax.f32 %v1703_v2, 0.0  ;;  %v1668_v47 = vadd.f32 %v1589_v6, %v1265_v27  ;;  %v1706_v21 = vadd.f32 %v3558_v48, %v1669_v46 }
 0x1f8   :  { %v2737_v50 = vpop.f32.mrf.mxu1 }
 0x1f9   :  { %v1705_v60 = vadd.f32 %v3558_v48, %v1668_v47  ;;  %v1671_v15 = vadd.f32 %v2737_v50, %v1280_v24  ;;  %2785 = vmatprep.mubr.msk.f32.mxu0 %vm679_vm2, %v1735_v52  ;;  %v1738_v43 = vmax.f32 %v1706_v21, 0.0  ;;  %v3681_v24 = vld [vmem:[%s3846_s3 + $0x2] ss:$0 sm:$0xff] }
 0x1fa   :  { %v1599_v31 = vpop.f32.mrf.mxu1  ;;  %2786 = vmatmul.mubr.msk.f32.gmra.mxu0 %vm679_vm2, %v1736_v12 }
 0x1fb   :  { %v1737_v29 = vmax.f32 %v1705_v60, 0.0  ;;  %v1670_v58 = vadd.f32 %v1599_v31, %v1275_v28  ;;  %v1708_v53 = vadd.f32 %v3558_v48, %v1671_v15 }
 0x1fc   :  { %v2740_v5 = vpop.f32.mrf.mxu1 }
 0x1fd   :  { %v1707_v32 = vadd.f32 %v3558_v48, %v1670_v58  ;;  %v1673_v51 = vadd.f32 %v2740_v5, %v1290_v1  ;;  %2788 = vmatprep.mubr.msk.f32.mxu0 %vm679_vm2, %v1737_v29  ;;  %v1740_v17 = vmax.f32 %v1708_v53, 0.0 }
 0x1fe   :  { %v1609_v11 = vpop.f32.mrf.mxu1  ;;  %2789 = vmatmul.mubr.msk.f32.gmra.mxu0 %vm679_vm2, %v1738_v43 }
 0x1ff   :  { %v1739_v33 = vmax.f32 %v1707_v32, 0.0  ;;  %v1672_v40 = vadd.f32 %v1609_v11, %v1285_v16  ;;  %v1710_v36 = vadd.f32 %v3558_v48, %v1673_v51 }
 0x200   :  { %v2743_v55 = vpop.f32.mrf.mxu1 }
 0x201   :  { %v1709_v30 = vadd.f32 %v3558_v48, %v1672_v40  ;;  %v1675_v7 = vadd.f32 %v2743_v55, %v1300_v54  ;;  %2791 = vmatprep.mubr.msk.f32.mxu0 %vm679_vm2, %v1739_v33  ;;  %v1742_v61 = vmax.f32 %v1710_v36, 0.0 }
 0x202   :  { %v1619_v20 = vpop.f32.mrf.mxu1  ;;  %2792 = vmatmul.mubr.msk.f32.gmra.mxu0 %vm679_vm2, %v1740_v17 }
 0x203   :  { %v1741_v35 = vmax.f32 %v1709_v30, 0.0  ;;  %v1674_v57 = vadd.f32 %v1619_v20, %v1295_v56  ;;  %v1712_v8 = vadd.f32 %v3558_v48, %v1675_v7 }
 0x204   :  { %v2746_v18 = vpop.f32.mrf.mxu1 }
 0x205   :  { %v1711_v37 = vadd.f32 %v3558_v48, %v1674_v57  ;;  %v1677_v19 = vadd.f32 %v2746_v18, %v1310_v39  ;;  %2794 = vmatprep.mubr.msk.f32.mxu0 %vm679_vm2, %v1741_v35  ;;  %v1744_v45 = vmax.f32 %v1712_v8, 0.0 }
 0x206   :  { %v1629_v63 = vpop.f32.mrf.mxu1  ;;  %2795 = vmatmul.mubr.msk.f32.gmra.mxu0 %vm679_vm2, %v1742_v61 }
 0x207   :  { %v1743_v38 = vmax.f32 %v1711_v37, 0.0  ;;  %v1676_v49 = vadd.f32 %v1629_v63, %v1305_v42  ;;  %v1714_v9 = vadd.f32 %v3558_v48, %v1677_v19 }
 0x208   :  { %v2749_v22 = vpop.f32.mrf.mxu1 }
 0x209   :  { %v1713_v41 = vadd.f32 %v3558_v48, %v1676_v49  ;;  %v1679_v0 = vadd.f32 %v2749_v22, %v1320_v23  ;;  %2797 = vmatprep.mubr.msk.f32.mxu0 %vm679_vm2, %v1743_v38  ;;  %v1746_v27 = vmax.f32 %v1714_v9, 0.0 }
 0x20a   :  { %v1639_v4 = vpop.f32.mrf.mxu1  ;;  %2798 = vmatmul.mubr.msk.f32.gmra.mxu0 %vm679_vm2, %v1744_v45 }
 0x20b   :  { %v1745_v10 = vmax.f32 %v1713_v41, 0.0  ;;  %v1678_v26 = vadd.f32 %v1639_v4, %v1315_v59  ;;  %v1716_v2 = vadd.f32 %v3558_v48, %v1679_v0 }
 0x20d   :  { %v1715_v46 = vadd.f32 %v3558_v48, %v1678_v26  ;;  %2800 = vmatprep.mubr.msk.f32.mxu0 %vm679_vm2, %v1745_v10  ;;  %v1748_v6 = vmax.f32 %v1716_v2, 0.0 }
 0x20e   :  { %2801 = vmatmul.mubr.msk.f32.gmra.mxu0 %vm679_vm2, %v1746_v27 }
 0x20f   :  { %v1747_v3 = vmax.f32 %v1715_v46, 0.0 }
 0x211   :  { %2803 = vmatprep.mubr.msk.f32.mxu0 %vm679_vm2, %v1747_v3 }
 0x212   :  { %2804 = vmatmul.mubr.msk.f32.gmra.mxu0 %vm679_vm2, %v1748_v6 }
 0x296   :  { %v2760_v52 = vpop.f32.mrf.mxu0 }
 0x297   :  { %v2080_v47 = vadd.f32 %v2760_v52, %v3681_v24 }
 0x298   :  { %v1915_v48 = vpop.f32.mrf.mxu0 }
 0x299   :  { %2113 = vst.msk [vmem:[%s3847_s4 + $0x8] sm:$0xff] %vm2111_vm5, %v2080_v47  ;;  %v2079_v12 = vadd.f32 %v3681_v24, %v1915_v48 }
 0x29a   :  { %v2763_v21 = vpop.f32.mrf.mxu0 }
 0x29b   :  { %2112 = vst.msk [vmem:[%s3847_s4] sm:$0xff] %vm2111_vm5, %v2079_v12  ;;  %v2082_v50 = vadd.f32 %v2763_v21, %v3681_v24 }
 0x29c   :  { %v1925_v28 = vpop.f32.mrf.mxu0 }
 0x29d   :  { %2115 = vst.msk [vmem:[%s3847_s4 + $0x18] sm:$0xff] %vm2111_vm5, %v2082_v50  ;;  %v2081_v60 = vadd.f32 %v3681_v24, %v1925_v28 }
 0x29e   :  { %v2766_v15 = vpop.f32.mrf.mxu0 }
 0x29f   :  { %2114 = vst.msk [vmem:[%s3847_s4 + $0x10] sm:$0xff] %vm2111_vm5, %v2081_v60  ;;  %v2084_v13 = vadd.f32 %v2766_v15, %v3681_v24 }
 0x2a0   :  { %v1935_v31 = vpop.f32.mrf.mxu0 }
 0x2a1   :  { %2117 = vst.msk [vmem:[%s3847_s4 + $0x28] sm:$0xff] %vm2111_vm5, %v2084_v13  ;;  %v2083_v1 = vadd.f32 %v3681_v24, %v1935_v31 }
 0x2a2   :  { %v2769_v29 = vpop.f32.mrf.mxu0 }
 0x2a3   :  { %2116 = vst.msk [vmem:[%s3847_s4 + $0x20] sm:$0xff] %vm2111_vm5, %v2083_v1  ;;  %v2086_v58 = vadd.f32 %v2769_v29, %v3681_v24 }
 0x2a4   :  { %v1945_v43 = vpop.f32.mrf.mxu0 }
 0x2a5   :  { %2119 = vst.msk [vmem:[%s3847_s4 + $0x38] sm:$0xff] %vm2111_vm5, %v2086_v58  ;;  %v2085_v53 = vadd.f32 %v3681_v24, %v1945_v43 }
 0x2a6   :  { %v2772_v5 = vpop.f32.mrf.mxu0 }
 0x2a7   :  { %2118 = vst.msk [vmem:[%s3847_s4 + $0x30] sm:$0xff] %vm2111_vm5, %v2085_v53  ;;  %v2088_v16 = vadd.f32 %v2772_v5, %v3681_v24 }
 0x2a8   :  { %v1955_v32 = vpop.f32.mrf.mxu0 }
 0x2a9   :  { %2121 = vst.msk [vmem:[%s3847_s4 + $0x48] sm:$0xff] %vm2111_vm5, %v2088_v16  ;;  %v2087_v51 = vadd.f32 %v3681_v24, %v1955_v32 }
 0x2aa   :  { %v2775_v34 = vpop.f32.mrf.mxu0 }
 0x2ab   :  { %2120 = vst.msk [vmem:[%s3847_s4 + $0x40] sm:$0xff] %vm2111_vm5, %v2087_v51  ;;  %v2090_v11 = vadd.f32 %v2775_v34, %v3681_v24 }
 0x2ac   :  { %v1965_v54 = vpop.f32.mrf.mxu0 }
 0x2ad   :  { %2123 = vst.msk [vmem:[%s3847_s4 + $0x58] sm:$0xff] %vm2111_vm5, %v2090_v11  ;;  %v2089_v33 = vadd.f32 %v3681_v24, %v1965_v54 }
 0x2ae   :  { %v2778_v40 = vpop.f32.mrf.mxu0 }
 0x2af   :  { %2122 = vst.msk [vmem:[%s3847_s4 + $0x50] sm:$0xff] %vm2111_vm5, %v2089_v33  ;;  %v2092_v17 = vadd.f32 %v2778_v40, %v3681_v24 }
 0x2b0   :  { %v1975_v36 = vpop.f32.mrf.mxu0 }
 0x2b1   :  { %2125 = vst.msk [vmem:[%s3847_s4 + $0x68] sm:$0xff] %vm2111_vm5, %v2092_v17  ;;  %v2091_v55 = vadd.f32 %v3681_v24, %v1975_v36 }
 0x2b2   :  { %v2781_v56 = vpop.f32.mrf.mxu0 }
 0x2b3   :  { %2124 = vst.msk [vmem:[%s3847_s4 + $0x60] sm:$0xff] %vm2111_vm5, %v2091_v55  ;;  %v2094_v30 = vadd.f32 %v2781_v56, %v3681_v24 }
 0x2b4   :  { %v1985_v7 = vpop.f32.mrf.mxu0 }
 0x2b5   :  { %2127 = vst.msk [vmem:[%s3847_s4 + $0x78] sm:$0xff] %vm2111_vm5, %v2094_v30  ;;  %v2093_v14 = vadd.f32 %v3681_v24, %v1985_v7 }
 0x2b6   :  { %v2784_v20 = vpop.f32.mrf.mxu0 }
 0x2b7   :  { %2126 = vst.msk [vmem:[%s3847_s4 + $0x70] sm:$0xff] %vm2111_vm5, %v2093_v14  ;;  %v2096_v39 = vadd.f32 %v2784_v20, %v3681_v24 }
 0x2b8   :  { %v1995_v35 = vpop.f32.mrf.mxu0 }
 0x2b9   :  { %2129 = vst.msk [vmem:[%s3847_s4 + $0x88] sm:$0xff] %vm2111_vm5, %v2096_v39  ;;  %v2095_v57 = vadd.f32 %v3681_v24, %v1995_v35 }
 0x2ba   :  { %v2787_v61 = vpop.f32.mrf.mxu0 }
 0x2bb   :  { %2128 = vst.msk [vmem:[%s3847_s4 + $0x80] sm:$0xff] %vm2111_vm5, %v2095_v57  ;;  %v2098_v8 = vadd.f32 %v2787_v61, %v3681_v24 }
 0x2bc   :  { %v2005_v18 = vpop.f32.mrf.mxu0 }
 0x2bd   :  { %2131 = vst.msk [vmem:[%s3847_s4 + $0x98] sm:$0xff] %vm2111_vm5, %v2098_v8  ;;  %v2097_v42 = vadd.f32 %v3681_v24, %v2005_v18 }
 0x2be   :  { %v2790_v37 = vpop.f32.mrf.mxu0 }
 0x2bf   :  { %2130 = vst.msk [vmem:[%s3847_s4 + $0x90] sm:$0xff] %vm2111_vm5, %v2097_v42  ;;  %v2100_v19 = vadd.f32 %v2790_v37, %v3681_v24 }
 0x2c0   :  { %v2015_v62 = vpop.f32.mrf.mxu0 }
 0x2c1   :  { %2133 = vst.msk [vmem:[%s3847_s4 + $0xa8] sm:$0xff] %vm2111_vm5, %v2100_v19  ;;  %v2099_v63 = vadd.f32 %v3681_v24, %v2015_v62 }
 0x2c2   :  { %v2793_v44 = vpop.f32.mrf.mxu0 }
 0x2c3   :  { %2132 = vst.msk [vmem:[%s3847_s4 + $0xa0] sm:$0xff] %vm2111_vm5, %v2099_v63  ;;  %v2102_v23 = vadd.f32 %v2793_v44, %v3681_v24 }
 0x2c4   :  { %v2025_v38 = vpop.f32.mrf.mxu0 }
 0x2c5   :  { %2135 = vst.msk [vmem:[%s3847_s4 + $0xb8] sm:$0xff] %vm2111_vm5, %v2102_v23  ;;  %v2101_v49 = vadd.f32 %v3681_v24, %v2025_v38 }
 0x2c6   :  { %v2796_v45 = vpop.f32.mrf.mxu0 }
 0x2c7   :  { %2134 = vst.msk [vmem:[%s3847_s4 + $0xb0] sm:$0xff] %vm2111_vm5, %v2101_v49  ;;  %v2104_v9 = vadd.f32 %v2796_v45, %v3681_v24 }
 0x2c8   :  { %v2035_v22 = vpop.f32.mrf.mxu0 }
 0x2c9   :  { %2137 = vst.msk [vmem:[%s3847_s4 + $0xc8] sm:$0xff] %vm2111_vm5, %v2104_v9  ;;  %v2103_v25 = vadd.f32 %v3681_v24, %v2035_v22 }
 0x2ca   :  { %v2799_v59 = vpop.f32.mrf.mxu0 }
 0x2cb   :  { %2136 = vst.msk [vmem:[%s3847_s4 + $0xc0] sm:$0xff] %vm2111_vm5, %v2103_v25  ;;  %v2106_v41 = vadd.f32 %v2799_v59, %v3681_v24 }
 0x2cc   :  { %v2045_v0 = vpop.f32.mrf.mxu0 }
 0x2cd   :  { %2139 = vst.msk [vmem:[%s3847_s4 + $0xd8] sm:$0xff] %vm2111_vm5, %v2106_v41  ;;  %v2105_v4 = vadd.f32 %v3681_v24, %v2045_v0 }
 0x2ce   :  { %v2802_v10 = vpop.f32.mrf.mxu0 }
 0x2cf   :  { %2138 = vst.msk [vmem:[%s3847_s4 + $0xd0] sm:$0xff] %vm2111_vm5, %v2105_v4  ;;  %v2108_v26 = vadd.f32 %v2802_v10, %v3681_v24 }
 0x2d0   :  { %v2055_v27 = vpop.f32.mrf.mxu0 }
 0x2d1   :  { %2141 = vst.msk [vmem:[%s3847_s4 + $0xe8] sm:$0xff] %vm2111_vm5, %v2108_v26  ;;  %v2107_v2 = vadd.f32 %v3681_v24, %v2055_v27 }
 0x2d2   :  { %v2805_v46 = vpop.f32.mrf.mxu0 }
 0x2d3   :  { %2140 = vst.msk [vmem:[%s3847_s4 + $0xe0] sm:$0xff] %vm2111_vm5, %v2107_v2  ;;  %v2110_v3 = vadd.f32 %v2805_v46, %v3681_v24 }
 0x2d4   :  { %v2065_v6 = vpop.f32.mrf.mxu0 }
 0x2d5   :  { %2143 = vst.msk [vmem:[%s3847_s4 + $0xf8] sm:$0xff] %vm2111_vm5, %v2110_v3  ;;  %v2109_v52 = vadd.f32 %v3681_v24, %v2065_v6 }
 0x2d7   :  { %2142 = vst.msk [vmem:[%s3847_s4 + $0xf0] sm:$0xff] %vm2111_vm5, %v2109_v52 }

</bundles_post_ra>
